<compile_context>
chip_gen: v5e
topology: v5e:2x2
jax: 0.10.0
libtpu: 0.0.40
codegen_flags: <defaults>
</compile_context>

<pallas_src>
import functools

import numpy as np
import jax
import jax.numpy as jnp
from jax import lax
from jax.experimental import pallas as pl
from jax.experimental.pallas import tpu as pltpu

T_KD = 3.0       # KLDivloss temperature used inside pos_Loss.cal_loss
_COS_EPS = 1e-8  # torch.nn.functional.cosine_similarity default eps


def _pick_tile(d):
    """Largest lane-aligned tile (<=512, per v7x VMEM guidance) dividing d."""
    for t in (512, 256, 128):
        if d % t == 0:
            return t
    return d  # small / awkward D: single full-width tile


def _pick_batch_block(b):
    """Batch row-block: a multiple of 8 dividing B, else the full batch."""
    for bb in (64, 32, 16, 8):
        if b % bb == 0:
            return bb
    return b


# --------------------------------------------------------------------------
# Kernel 1: stacked real DFT as a tiled MXU matmul with the cosine block
# generated on the fly; writes the four DFT results as separate outputs.
# --------------------------------------------------------------------------
def _dft_kernel(x_ref, o_s_ref, o_t_ref, o_sp_ref, o_tp_ref, acc_ref,
                *, dim, tk, tn, batch):
    jo = pl.program_id(0)   # output (frequency) tile
    kr = pl.program_id(1)   # reduction (input position) tile

    @pl.when(kr == 0)
    def _():
        acc_ref[...] = jnp.zeros_like(acc_ref)

    x = x_ref[...]                                           # (4B, tk) f32

    # Generate the (tk, tn) block of C[n, f] = cos(2*pi*(n*f mod D)/D).
    # NOTE: n*f is exact in int32 for D <= 46340 (int32 overflow beyond that;
    # larger D would need a wider modular reduction).  The quotient is
    # estimated in f32 and only used to shift the phase by multiples of 2*pi,
    # so an off-by-one there does not change the cosine.
    n0 = kr * tk
    f0 = jo * tn
    n_idx = lax.broadcasted_iota(jnp.int32, (tk, tn), 0) + n0
    f_idx = lax.broadcasted_iota(jnp.int32, (tk, tn), 1) + f0
    nk = n_idx * f_idx
    q = jnp.floor(nk.astype(jnp.float32) * (1.0 / dim)).astype(jnp.int32)
    r = (nk - q * dim).astype(jnp.float32)                   # == nk (mod D), small
    c = jnp.cos(r * (2.0 * np.pi / dim))                     # (tk, tn) f32 on EUP

    acc_ref[...] += jnp.dot(x, c, preferred_element_type=jnp.float32)

    @pl.when(kr == pl.num_programs(1) - 1)
    def _():
        acc = acc_ref[...]
        o_s_ref[...] = acc[0 * batch:1 * batch]
        o_t_ref[...] = acc[1 * batch:2 * batch]
        o_sp_ref[...] = acc[2 * batch:3 * batch]
        o_tp_ref[...] = acc[3 * batch:4 * batch]


def dft_real_stacked(x4, batch):
    """x4: (4B, D) = [sigmoid(s); sigmoid(t); s; t] -> 4 real-DFT arrays (B, D)."""
    r4, d = x4.shape
    t = _pick_tile(d)
    tk = tn = t
    n_col_tiles = d // tn
    n_red_tiles = d // tk

    kernel = functools.partial(_dft_kernel, dim=d, tk=tk, tn=tn, batch=batch)
    cost = pl.CostEstimate(
        flops=2 * r4 * d * d,                       # one (4B,D)@(D,D) matmul
        transcendentals=d * d,                      # on-the-fly cosine blocks
        bytes_accessed=4 * (r4 * d * n_col_tiles + r4 * d),
    )
    # TODO(synk): x feeds the MXU in f32; bf16 inputs (f32 accumulate) would be
    # faster on v5e/v6e/v7x but was left off to keep the KL-product accurate.
    out_sds = jax.ShapeDtypeStruct((batch, d), jnp.float32)
    return pl.pallas_call(
        kernel,
        out_shape=(out_sds, out_sds, out_sds, out_sds),
        grid_spec=pltpu.PrefetchScalarGridSpec(
            num_scalar_prefetch=0,
            grid=(n_col_tiles, n_red_tiles),
            in_specs=[pl.BlockSpec((r4, tk), lambda j, k: (0, k))],
            out_specs=[pl.BlockSpec((batch, tn), lambda j, k: (0, j))] * 4,
            scratch_shapes=[pltpu.VMEM((r4, tn), jnp.float32)],
        ),
        compiler_params=pltpu.CompilerParams(
            dimension_semantics=("parallel", "arbitrary"),
            vmem_limit_bytes=32 * 1024 * 1024,
        ),
        cost_estimate=cost,
    )(x4)


# --------------------------------------------------------------------------
# Kernel 2: KL divergences + cosine similarity + final scalar combine,
# gridded over batch-row blocks with persistent accumulators.
# --------------------------------------------------------------------------
def _loss_kernel(sfs_ref, sft_ref, pfs_ref, pft_ref, pos_s_ref, pos_t_ref,
                 o_ref, kl1_acc, kl2_acc, cos_acc, *, temp, batch):
    i = pl.program_id(0)

    @pl.when(i == 0)
    def _():
        kl1_acc[...] = jnp.zeros_like(kl1_acc)
        kl2_acc[...] = jnp.zeros_like(kl2_acc)
        cos_acc[...] = jnp.zeros_like(cos_acc)

    inv_t = 1.0 / temp

    def kl_partial(y_s, y_t):
        ys = y_s * inv_t
        yt = y_t * inv_t
        # log_softmax(ys, axis=1)
        ys_sh = ys - jnp.max(ys, axis=1, keepdims=True)
        log_ps = ys_sh - jnp.log(jnp.sum(jnp.exp(ys_sh), axis=1, keepdims=True))
        # softmax(yt, axis=1) and its log
        yt_sh = yt - jnp.max(yt, axis=1, keepdims=True)
        e = jnp.exp(yt_sh)
        den = jnp.sum(e, axis=1, keepdims=True)
        p_t = e * pl.reciprocal(den, approx=True)      # divide -> EUP
        log_pt = yt_sh - jnp.log(den)
        # F.kl_div(log_ps, p_t, size_average=False) partial sum over this block
        return jnp.sum(p_t * (log_pt - log_ps), axis=(0, 1), keepdims=True)

    kl1_acc[...] += kl_partial(sfs_ref[...], sft_ref[...])
    kl2_acc[...] += kl_partial(pfs_ref[...], pft_ref[...])

    # F.cosine_similarity(s_pos, t_pos, dim=1)^2 partial sum (rsqrt on EUP).
    a = pos_s_ref[...]
    b = pos_t_ref[...]
    dotv = jnp.sum(a * b, axis=1, keepdims=True)
    na2 = jnp.sum(a * a, axis=1, keepdims=True)
    nb2 = jnp.sum(b * b, axis=1, keepdims=True)
    cos = dotv * lax.rsqrt(jnp.maximum(na2 * nb2, _COS_EPS * _COS_EPS))
    cos_acc[...] += jnp.sum(cos * cos, axis=(0, 1), keepdims=True)

    @pl.when(i == pl.num_programs(0) - 1)
    def _():
        scale = (temp * temp) / batch
        kl1 = kl1_acc[...] * scale
        kl2 = kl2_acc[...] * scale
        cos_mean = cos_acc[...] * (1.0 / batch)
        o_ref[...] = kl1 * kl2 / cos_mean              # single exact divide


def loss_combine(sfft_s, sfft_t, pfft_s, pfft_t, pos_s, pos_t, temp):
    # TODO(synk): full-D rows per block (softmax needs the whole row); for very
    # large D this kernel would additionally need a D-tiled online softmax.
    b, d = sfft_s.shape
    bb = _pick_batch_block(b)
    nb = b // bb
    spec = pl.BlockSpec((bb, d), lambda i: (i, 0))
    kernel = functools.partial(_loss_kernel, temp=float(temp), batch=float(b))
    out = pl.pallas_call(
        kernel,
        out_shape=jax.ShapeDtypeStruct((1, 1), jnp.float32),
        grid_spec=pltpu.PrefetchScalarGridSpec(
            num_scalar_prefetch=0,
            grid=(nb,),
            in_specs=[spec] * 6,
            out_specs=pl.BlockSpec((1, 1), lambda i: (0, 0)),
            scratch_shapes=[pltpu.VMEM((1, 1), jnp.float32),
                            pltpu.VMEM((1, 1), jnp.float32),
                            pltpu.VMEM((1, 1), jnp.float32)],
        ),
        compiler_params=pltpu.CompilerParams(
            # batch blocks accumulate into shared scratch -> sequential axis
            dimension_semantics=("arbitrary",),
            vmem_limit_bytes=32 * 1024 * 1024,
        ),
    )(sfft_s, sfft_t, pfft_s, pfft_t, pos_s, pos_t)
    return out[0, 0]


# --------------------------------------------------------------------------
# Wrapper: flatten, stack the four DFT operands (sigmoid fused in XLA once),
# call the Pallas kernels.
# --------------------------------------------------------------------------
def pos_loss(s_out, t_out, beta=2):  # beta is stored but unused in forward
    b = s_out.shape[0]
    s_flat = s_out.reshape(b, -1).astype(jnp.float32)
    t_flat = t_out.reshape(b, -1).astype(jnp.float32)

    # TODO(synk): fk_solver is undefined in the reference; identity transform.
    s_pos = s_flat
    t_pos = t_flat

    # Stack [sigmoid(s); sigmoid(t); s; t] once (sigmoid computed a single
    # time here instead of per output-column tile inside the kernel).
    raw = jnp.concatenate([s_flat, t_flat], axis=0)               # (2B, D)
    x4 = jnp.concatenate([jax.nn.sigmoid(raw), raw], axis=0)      # (4B, D)

    s_fft, t_fft, sp_fft, tp_fft = dft_real_stacked(x4, batch=b)

    return loss_combine(s_fft, t_fft, sp_fft, tp_fft, s_pos, t_pos, T_KD)


# --------------------------------------------------------------------------
# NumPy reference (mirrors the PyTorch semantics, fk_solver = identity).
# --------------------------------------------------------------------------
def _np_log_softmax(x, axis):
    x = x - x.max(axis=axis, keepdims=True)
    return x - np.log(np.exp(x).sum(axis=axis, keepdims=True))


def _np_softmax(x, axis):
    x = x - x.max(axis=axis, keepdims=True)
    e = np.exp(x)
    return e / e.sum(axis=axis, keepdims=True)


def ref_pos_loss(s_out, t_out):
    b = s_out.shape[0]
    s = np.asarray(s_out, dtype=np.float64).reshape(b, -1)
    t = np.asarray(t_out, dtype=np.float64).reshape(b, -1)
    s_pos, t_pos = s, t  # fk_solver = identity
    s_fft = np.fft.fft(1.0 / (1.0 + np.exp(-s))).real
    t_fft = np.fft.fft(1.0 / (1.0 + np.exp(-t))).real
    sp_fft = np.fft.fft(s_pos).real
    tp_fft = np.fft.fft(t_pos).real
    temp = T_KD

    def kl(y_s, y_t):
        log_ps = _np_log_softmax(y_s / temp, axis=1)
        p_t = _np_softmax(y_t / temp, axis=1)
        return (p_t * (np.log(p_t) - log_ps)).sum() * temp * temp / b

    dot = (s_pos * t_pos).sum(axis=1)
    ns = np.linalg.norm(s_pos, axis=1)
    nt = np.linalg.norm(t_pos, axis=1)
    cos = dot / np.maximum(ns * nt, _COS_EPS)
    return kl(s_fft, t_fft) * kl(sp_fft, tp_fft) / np.mean(cos ** 2)


if __name__ == "__main__":
    # Small NCHW inputs: B=2, C=3, H=W=4 -> flattened D=48 (48 = 16*3,
    # consistent with the unused view(-1, 16, 3) in the reference).
    key = jax.random.PRNGKey(0)
    k1, k2 = jax.random.split(key)
    s_out = jax.random.normal(k1, (2, 3, 4, 4), dtype=jnp.float32)
    t_out = jax.random.normal(k2, (2, 3, 4, 4), dtype=jnp.float32)

    loss = jax.block_until_ready(pos_loss(s_out, t_out))
    ref = ref_pos_loss(np.asarray(s_out), np.asarray(t_out))

    np.testing.assert_allclose(np.asarray(loss), ref, rtol=5e-2, atol=1e-4)
    print("KERNEL_OK")
</pallas_src>

<mosaic_0001>
module attributes {stable_mosaic.version = 11 : i64} {
  func.func @_dft_kernel(%arg0: i32, %arg1: i32, %arg2: memref<8x48xf32, #tpu.memory_space<vmem>>, %arg3: memref<2x48xf32, #tpu.memory_space<vmem>>, %arg4: memref<2x48xf32, #tpu.memory_space<vmem>>, %arg5: memref<2x48xf32, #tpu.memory_space<vmem>>, %arg6: memref<2x48xf32, #tpu.memory_space<vmem>>, %arg7: memref<8x48xf32, #tpu.memory_space<vmem>>) attributes {dimension_semantics = [#tpu.dimension_semantics<parallel>, #tpu.dimension_semantics<arbitrary>], iteration_bounds = array<i64: 1, 1>, scalar_prefetch = 0 : i64, scratch_operands = 1 : i64, tpu.core_type = #tpu.core_type<tc>, window_params = [{transform_indices = @transform_0, window_bounds = array<i64: 8, 48>}, {transform_indices = @transform_1, window_bounds = array<i64: 2, 48>}, {transform_indices = @transform_2, window_bounds = array<i64: 2, 48>}, {transform_indices = @transform_3, window_bounds = array<i64: 2, 48>}, {transform_indices = @transform_4, window_bounds = array<i64: 2, 48>}]} {
    %c0_i32 = arith.constant 0 : i32
    %0 = arith.cmpi eq, %arg1, %c0_i32 : i32
    %1 = arith.extui %0 : i1 to i32
    %c0_i32_0 = arith.constant 0 : i32
    %2 = arith.cmpi ne, %1, %c0_i32_0 : i32
    scf.if %2 {
      %cst_12 = arith.constant 0.000000e+00 : f32
      %32 = vector.broadcast %cst_12 : f32 to vector<8x48xf32>
      %c0_13 = arith.constant 0 : index
      %c0_14 = arith.constant 0 : index
      %33 = vector.load %arg7[%c0_13, %c0_14] : memref<8x48xf32, #tpu.memory_space<vmem>>, vector<8x48xf32>
      tpu.vector_store %arg7[%c0_13, %c0_14], %32 {strides = array<i32>} : memref<8x48xf32, #tpu.memory_space<vmem>>, vector<8x48xf32>,
    } else {
    }
    %c0 = arith.constant 0 : index
    %c0_1 = arith.constant 0 : index
    %3 = vector.load %arg2[%c0, %c0_1] : memref<8x48xf32, #tpu.memory_space<vmem>>, vector<8x48xf32>
    %c48_i32 = arith.constant 48 : i32
    %4 = arith.muli %arg1, %c48_i32 : i32
    %c48_i32_2 = arith.constant 48 : i32
    %5 = arith.muli %arg0, %c48_i32_2 : i32
    %6 = tpu.iota {dimensions = array<i32: 0>} : vector<48x48xi32>
    %7 = vector.broadcast %4 : i32 to vector<48x48xi32>
    %8 = arith.addi %6, %7 : vector<48x48xi32>
    %9 = tpu.iota {dimensions = array<i32: 1>} : vector<48x48xi32>
    %10 = vector.broadcast %5 : i32 to vector<48x48xi32>
    %11 = arith.addi %9, %10 : vector<48x48xi32>
    %12 = arith.muli %8, %11 : vector<48x48xi32>
    %13 = arith.sitofp %12 : vector<48x48xi32> to vector<48x48xf32>
    %cst = arith.constant 0.020833334 : f32
    %14 = vector.broadcast %cst : f32 to vector<48x48xf32>
    %15 = arith.mulf %13, %14 : vector<48x48xf32>
    %16 = math.floor %15 : vector<48x48xf32>
    %17 = arith.fptosi %16 : vector<48x48xf32> to vector<48x48xi32>
    %c48_i32_3 = arith.constant 48 : i32
    %18 = vector.broadcast %c48_i32_3 : i32 to vector<48x48xi32>
    %19 = arith.muli %17, %18 : vector<48x48xi32>
    %20 = arith.subi %12, %19 : vector<48x48xi32>
    %21 = arith.sitofp %20 : vector<48x48xi32> to vector<48x48xf32>
    %cst_4 = arith.constant 0.130899698 : f32
    %22 = vector.broadcast %cst_4 : f32 to vector<48x48xf32>
    %23 = arith.mulf %21, %22 : vector<48x48xf32>
    %24 = math.cos %23 : vector<48x48xf32>
    %c0_5 = arith.constant 0 : index
    %c0_6 = arith.constant 0 : index
    %25 = vector.load %arg7[%c0_5, %c0_6] : memref<8x48xf32, #tpu.memory_space<vmem>>, vector<8x48xf32>
    %cst_7 = arith.constant dense<0.000000e+00> : vector<8x48xf32>
    %26 = tpu.matmul %3, %24, %cst_7 {dimension_numbers = #tpu.dot_dimension_numbers<[1], [0], [0], [1], [0, 0, 1, 1], [], []>} : vector<8x48xf32>, vector<48x48xf32>, vector<8x48xf32> -> vector<8x48xf32>
    %27 = arith.addf %25, %26 : vector<8x48xf32>
    %c0_8 = arith.constant 0 : index
    %c0_9 = arith.constant 0 : index
    %28 = vector.load %arg7[%c0_8, %c0_9] : memref<8x48xf32, #tpu.memory_space<vmem>>, vector<8x48xf32>
    tpu.vector_store %arg7[%c0_8, %c0_9], %27 {strides = array<i32>} : memref<8x48xf32, #tpu.memory_space<vmem>>, vector<8x48xf32>,
    %c0_i32_10 = arith.constant 0 : i32
    %29 = arith.cmpi eq, %arg1, %c0_i32_10 : i32
    %30 = arith.extui %29 : i1 to i32
    %c0_i32_11 = arith.constant 0 : i32
    %31 = arith.cmpi ne, %30, %c0_i32_11 : i32
    scf.if %31 {
      %c0_12 = arith.constant 0 : index
      %c0_13 = arith.constant 0 : index
      %32 = vector.load %arg7[%c0_12, %c0_13] : memref<8x48xf32, #tpu.memory_space<vmem>>, vector<8x48xf32>
      %33 = vector.extract_strided_slice %32 {offsets = [0, 0], sizes = [2, 48], strides = [1, 1]} : vector<8x48xf32> to vector<2x48xf32>
      %c0_14 = arith.constant 0 : index
      %c0_15 = arith.constant 0 : index
      %34 = vector.load %arg3[%c0_14, %c0_15] : memref<2x48xf32, #tpu.memory_space<vmem>>, vector<2x48xf32>
      tpu.vector_store %arg3[%c0_14, %c0_15], %33 {strides = array<i32>} : memref<2x48xf32, #tpu.memory_space<vmem>>, vector<2x48xf32>,
      %35 = vector.extract_strided_slice %32 {offsets = [2, 0], sizes = [2, 48], strides = [1, 1]} : vector<8x48xf32> to vector<2x48xf32>
      %c0_16 = arith.constant 0 : index
      %c0_17 = arith.constant 0 : index
      %36 = vector.load %arg4[%c0_16, %c0_17] : memref<2x48xf32, #tpu.memory_space<vmem>>, vector<2x48xf32>
      tpu.vector_store %arg4[%c0_16, %c0_17], %35 {strides = array<i32>} : memref<2x48xf32, #tpu.memory_space<vmem>>, vector<2x48xf32>,
      %37 = vector.extract_strided_slice %32 {offsets = [4, 0], sizes = [2, 48], strides = [1, 1]} : vector<8x48xf32> to vector<2x48xf32>
      %c0_18 = arith.constant 0 : index
      %c0_19 = arith.constant 0 : index
      %38 = vector.load %arg5[%c0_18, %c0_19] : memref<2x48xf32, #tpu.memory_space<vmem>>, vector<2x48xf32>
      tpu.vector_store %arg5[%c0_18, %c0_19], %37 {strides = array<i32>} : memref<2x48xf32, #tpu.memory_space<vmem>>, vector<2x48xf32>,
      %39 = vector.extract_strided_slice %32 {offsets = [6, 0], sizes = [2, 48], strides = [1, 1]} : vector<8x48xf32> to vector<2x48xf32>
      %c0_20 = arith.constant 0 : index
      %c0_21 = arith.constant 0 : index
      %40 = vector.load %arg6[%c0_20, %c0_21] : memref<2x48xf32, #tpu.memory_space<vmem>>, vector<2x48xf32>
      tpu.vector_store %arg6[%c0_20, %c0_21], %39 {strides = array<i32>} : memref<2x48xf32, #tpu.memory_space<vmem>>, vector<2x48xf32>,
    } else {
    }
    return
  }
  func.func @transform_0(%arg0: i32, %arg1: i32) -> (i32, i32) {
    %c0_i32 = arith.constant 0 : i32
    %c0_i32_0 = arith.constant 0 : i32
    return %c0_i32, %arg1 : i32, i32
  }
  func.func @transform_1(%arg0: i32, %arg1: i32) -> (i32, i32) {
    %c0_i32 = arith.constant 0 : i32
    %c0_i32_0 = arith.constant 0 : i32
    return %c0_i32, %arg0 : i32, i32
  }
  func.func @transform_2(%arg0: i32, %arg1: i32) -> (i32, i32) {
    %c0_i32 = arith.constant 0 : i32
    %c0_i32_0 = arith.constant 0 : i32
    return %c0_i32, %arg0 : i32, i32
  }
  func.func @transform_3(%arg0: i32, %arg1: i32) -> (i32, i32) {
    %c0_i32 = arith.constant 0 : i32
    %c0_i32_0 = arith.constant 0 : i32
    return %c0_i32, %arg0 : i32, i32
  }
  func.func @transform_4(%arg0: i32, %arg1: i32) -> (i32, i32) {
    %c0_i32 = arith.constant 0 : i32
    %c0_i32_0 = arith.constant 0 : i32
    return %c0_i32, %arg0 : i32, i32
  }
}

</mosaic_0001>

<bundles_post_ra>
// kernel: tpu_custom_call.1
= control target key start
LH: loop header
LB: loop body
LE: loop exit
PB: predicated region body
PF: predicated region fallthrough
CT: control target
= control target key end

     0   :  { %10 = vsyncpa [#allocation4], 0  ;;  %s2379_s0 = inlined_call_operand.hbm [shape: f32[8,48], index: 0, kind: input, shape index: {}]   ;;  %s2380_s1 = inlined_call_operand.hbm [shape: f32[2,48], index: 1, kind: output, shape index: {0}]   ;;  %s2381_s2 = inlined_call_operand.hbm [shape: f32[2,48], index: 2, kind: output, shape index: {1}]   ;;  %s2382_s3 = inlined_call_operand.hbm [shape: f32[2,48], index: 3, kind: output, shape index: {2}]   ;;  %s2383_s4 = inlined_call_operand.hbm [shape: f32[2,48], index: 4, kind: output, shape index: {3}]  }
   0x1   :  { %11 = vsyncpa [#allocation5], 0 }
   0x2   :  { %12 = vsyncpa [#allocation8], 0 }
   0x3   :  { %13 = vsyncpa [#allocation11], 0  ;;  %s19_s17 = sshll.u32 %s2379_s0, 4  ;;  %s1309_s18 = smov [#allocation3]   ;;  %vm2390_vm0 = vcmask 392192   ;;  %v38_v0 = vlaneseq  ;;  %s20_s17 = int_to_ptr.hbm [resolvable:$true] %s19_s17 }
   0x4   :  { %s21_s19 = sshll.u32 %s1309_s18, 4  ;;  %s22_s19 = int_to_ptr.vmem [resolvable:$true] %s21_s19 }
   0x5   :  { %24 = dma.hbm_to_vmem [thread:$0]  %s20_s17, 128, %s22_s19, [#allocation4]  }
   0x6   :  { %1301 = dma.done.wait [#allocation4], 128  }
   0x7   :  { %1302 = vsyncadd [#allocation4], 4294967168  ;;  %v1310_v1 = vmov 0.0   ;;  %v1351_v2 = vshrl.u32 %v38_v0, 7  ;;  %v1353_v3 = vand.u32 127, %v38_v0  ;;  %s1318_s0 = smov [#allocation7]  }
   0x8   :  { %34 = vst.msk [vmem:[#allocation2] sm:$0xff] %vm2390_vm0, %v1310_v1  ;;  %v1311_v34 = vmov 2102212464   ;;  %v1312_v36 = vmov 920167782   ;;  %s1089_s20 = sshll.u32 %s1318_s0, 4  ;;  %s1090_s20 = int_to_ptr.vmem [resolvable:$true] %s1089_s20 }
   0x9   :  { %v40_v4 = vadd.s32 8, %v1351_v2  ;;  %v56_v5 = vmul.u32 %v1353_v3, %v1351_v2  ;;  %v41_v21 = vadd.s32 16, %v1351_v2  ;;  %v1313_v41 = vmov 1326507024   ;;  %s1091_s23 = sshll.u32 %s2381_s2, 4  ;;  %s1319_s24 = smov [#allocation6]   ;;  %s1092_s23 = int_to_ptr.hbm [resolvable:$true] %s1091_s23 }
   0xa   :  { %v1314_v44 = vmov 683565275   ;;  %v1315_v46 = vmov 2475754826   ;;  %v1316_v50 = vmov 2131351028  }
   0xb   :  { %v57_v6 = vmul.u32 %v1353_v3, %v40_v4  ;;  %v62_v7 = vcvt.s32.f32 %v56_v5  ;;  %v58_v25 = vmul.u32 %v1353_v3, %v41_v21  ;;  %s1078_s25 = sshll.u32 %s1319_s24, 4  ;;  %s1080_s28 = sshll.u32 %s2380_s1, 4  ;;  %s1079_s25 = int_to_ptr.vmem [resolvable:$true] %s1078_s25  ;;  %s1081_s28 = int_to_ptr.hbm [resolvable:$true] %s1080_s28 }
   0xc   :  { %s1320_s29 = smov [#allocation9]   ;;  %s1102_s7 = sshll.u32 %s2382_s3, 4  ;;  %s1103_s7 = int_to_ptr.hbm [resolvable:$true] %s1102_s7 }
   0xd   :  { %v68_v8 = vmul.f32 0.020833334, %v62_v7  ;;  %v63_v9 = vcvt.s32.f32 %v57_v6  ;;  %v64_v29 = vcvt.s32.f32 %v58_v25  ;;  %s1100_s30 = sshll.u32 %s1320_s29, 4  ;;  %s1321_s8 = smov [#allocation10]   ;;  %s1101_s30 = int_to_ptr.vmem [resolvable:$true] %s1100_s30 }
   0xe   :  { %s1111_s9 = sshll.u32 %s1321_s8, 4  ;;  %s1113_s11 = sshll.u32 %s2383_s4, 4  ;;  %s1112_s9 = int_to_ptr.vmem [resolvable:$true] %s1111_s9  ;;  %s1114_s11 = int_to_ptr.hbm [resolvable:$true] %s1113_s11 }
   0xf   :  { %v74_v10 = vfloor.f32 %v68_v8  ;;  %v69_v12 = vmul.f32 0.020833334, %v63_v9  ;;  %v70_v32 = vmul.f32 0.020833334, %v64_v29 }
  0x11   :  { %v1157_v11 = vcvt.f32.s32 %v74_v10  ;;  %v75_v15 = vfloor.f32 %v69_v12  ;;  %v76_v43 = vfloor.f32 %v70_v32 }
  0x13   :  { %v86_v13 = vmul.u32 48, %v1157_v11  ;;  %v1159_v18 = vcvt.f32.s32 %v75_v15  ;;  %v1161_v57 = vcvt.f32.s32 %v76_v43  ;;  %v43_v43 = vadd.s32 32, %v1351_v2 }
  0x15   :  { %v92_v14 = vsub.s32 %v56_v5, %v86_v13  ;;  %v87_v22 = vmul.u32 48, %v1159_v18  ;;  %v88_v1 = vmul.u32 48, %v1161_v57 }
  0x17   :  { %v98_v16 = vcvt.s32.f32 %v92_v14  ;;  %v93_v26 = vsub.s32 %v57_v6, %v87_v22  ;;  %v94_v10 = vsub.s32 %v58_v25, %v88_v1 }
  0x19   :  { %v1359_v17 = vmul.f32 0.1308997, %v98_v16  ;;  %v99_v30 = vcvt.s32.f32 %v93_v26  ;;  %v100_v16 = vcvt.s32.f32 %v94_v10 }
  0x1b   :  { %v113_v19 = vand.u32 2139095040, %v1359_v17  ;;  %v1366_v33 = vmul.f32 0.1308997, %v99_v30  ;;  %v2387_v38 = vand.u32 2147483647, %v1359_v17 }
  0x1d   :  { %v114_v20 = vshrl.u32 %v113_v19, 23  ;;  %v267_v48 = vand.u32 2139095040, %v1366_v33  ;;  %v117_v55 = vand.u32 8388607, %v2387_v38  ;;  %v42_v19 = vadd.s32 24, %v1351_v2 }
  0x1f   :  { %v1137_v23 = vadd.s32 4294967169, %v114_v20  ;;  %v268_v61 = vshrl.u32 %v267_v48, 23  ;;  %v118_v63 = vor.u32 8388608, %v117_v55 }
  0x21   :  { %v120_v24 = vadd.s32 1, %v1137_v23  ;;  %v1140_v6 = vadd.s32 4294967169, %v268_v61  ;;  %v1416_v9 = vshll.u32 %v118_v63, 8  ;;  %v1427_v23 = vmul.f32 0.1308997, %v100_v16 }
  0x22   :  { %v1317_v61 = vmov 0   ;;  %v2386_v63 = vand.u32 2147483647, %v1366_v33 }
  0x23   :  { %vm121_vm1 = vcmp.gt.s32.totalorder %v120_v24, 0  ;;  %v274_v13 = vadd.s32 1, %v1140_v6  ;;  %v159_v14 = vand.u32 65535, %v1416_v9  ;;  %v160_v20 = vshrl.u32 %v1416_v9, 16 }
  0x24   :  { %v122_v27 = vsel %vm121_vm1, %v120_v24, 0 }
  0x25   :  { %v124_v28 = vand.u32 31, %v122_v27  ;;  %v1372_v39 = vshrl.u32 %v122_v27, 5  ;;  %vm275_vm6 = vcmp.gt.s32.totalorder %v274_v13, 0  ;;  %v1432_v27 = vmul.u32 %v1353_v3, %v42_v19 }
  0x26   :  { %v276_v26 = vsel %vm275_vm6, %v274_v13, 0 }
  0x27   :  { %v1364_v31 = vsub.s32 32, %v124_v28  ;;  %v136_v35 = vshll.u32 %v1311_v34, %v124_v28  ;;  %v139_v40 = vshll.u32 %v1312_v36, %v124_v28  ;;  %v127_v45 = vshll.u32 %v1314_v44, %v124_v28 }
  0x28   :  { %v130_v47 = vshll.u32 %v1315_v46, %v124_v28  ;;  %v133_v52 = vshll.u32 %v1316_v50, %v124_v28  ;;  %vm145_vm2 = vcmp.lt.s32.totalorder %v1372_v39, 4  ;;  %vm142_vm3 = vcmp.lt.s32.totalorder %v1372_v39, 1 }
  0x29   :  { %v137_v37 = vshrl.u32 %v1312_v36, %v1364_v31  ;;  %v140_v42 = vshrl.u32 %v1313_v41, %v1364_v31  ;;  %v128_v49 = vshrl.u32 %v1315_v46, %v1364_v31  ;;  %v131_v51 = vshrl.u32 %v1316_v50, %v1364_v31 }
  0x2a   :  { %v134_v53 = vshrl.u32 %v1311_v34, %v1364_v31  ;;  %vm144_vm4 = vcmp.lt.s32.totalorder %v1372_v39, 3  ;;  %vm143_vm5 = vcmp.lt.s32.totalorder %v1372_v39, 2  ;;  %v278_v32 = vand.u32 31, %v276_v26 }
  0x2b   :  { %v138_v54 = vor.u32 %v137_v37, %v136_v35  ;;  %v141_v56 = vor.u32 %v140_v42, %v139_v40  ;;  %v1390_v58 = vor.u32 %v128_v49, %v127_v45  ;;  %v1392_v59 = vor.u32 %v131_v51, %v130_v47 }
  0x2c   :  { %v1394_v60 = vor.u32 %v134_v53, %v133_v52  ;;  %v421_v42 = vand.u32 2139095040, %v1427_v23  ;;  %v65_v45 = vcvt.s32.f32 %v1432_v27  ;;  %v1446_v49 = vsub.s32 32, %v278_v32 }
  0x2d   :  { %v151_v62 = vsel %vm145_vm2, %v138_v54, 920167782  ;;  %v155_v0 = vsel %vm145_vm2, %v141_v56, 1326507024  ;;  %v150_v4 = vsel %vm142_vm3, %v1390_v58, %v1392_v59  ;;  %v290_v1 = vshll.u32 %v1311_v34, %v278_v32 }
  0x2e   :  { %v152_v5 = vsel %vm144_vm4, %v1394_v60, %v151_v62  ;;  %v154_v7 = vsel %vm142_vm3, %v1392_v59, %v1394_v60  ;;  %v156_v8 = vsel %vm144_vm4, %v138_v54, %v155_v0  ;;  %v422_v53 = vshrl.u32 %v421_v42, 23 }
  0x2f   :  { %v153_v11 = vsel %vm143_vm5, %v150_v4, %v152_v5  ;;  %v157_v12 = vsel %vm143_vm5, %v154_v7, %v156_v8  ;;  %v1450_v54 = vmul.u32 %v1353_v3, %v43_v43  ;;  %v71_v56 = vmul.f32 0.020833334, %v65_v45 }
  0x30   :  { %v184_v15 = vshrl.u32 %v153_v11, 16  ;;  %v162_v18 = vshrl.u32 %v157_v12, 16  ;;  %v183_v21 = vand.u32 65535, %v153_v11  ;;  %v161_v24 = vand.u32 65535, %v157_v12 }
  0x31   :  { %v291_v4 = vshrl.u32 %v1312_v36, %v1446_v49  ;;  %v1461_v5 = vshrl.u32 %v276_v26, 5  ;;  %v281_v6 = vshll.u32 %v1314_v44, %v278_v32  ;;  %v1143_v7 = vadd.s32 4294967169, %v422_v53 }
  0x32   :  { %v1425_v22 = vmul.u32 %v184_v15, %v159_v14  ;;  %v1429_v25 = vmul.u32 %v162_v18, %v159_v14  ;;  %v185_v28 = vmul.u32 %v183_v21, %v159_v14  ;;  %v1434_v29 = vmul.u32 %v183_v21, %v160_v20 }
  0x33   :  { %v163_v35 = vmul.u32 %v161_v24, %v159_v14  ;;  %v1437_v37 = vmul.u32 %v161_v24, %v160_v20  ;;  %v188_v55 = vmul.u32 %v184_v15, %v160_v20  ;;  %v166_v57 = vmul.u32 %v162_v18, %v160_v20 }
  0x34   :  { %v189_v30 = vshll.u32 %v1425_v22, 16  ;;  %v167_v40 = vshll.u32 %v1429_v25, 16  ;;  %v191_v47 = vshll.u32 %v1434_v29, 16  ;;  %v282_v10 = vshrl.u32 %v1315_v46, %v1446_v49 }
  0x35   :  { %v169_v51 = vshll.u32 %v1437_v37, 16  ;;  %v284_v11 = vshll.u32 %v1315_v46, %v278_v32  ;;  %v285_v12 = vshrl.u32 %v1316_v50, %v1446_v49  ;;  %v287_v15 = vshll.u32 %v1316_v50, %v278_v32 }
  0x36   :  { %vm193_vm7 = vc.u32 %v185_v28, %v189_v30  ;;  %v1444_v48 = vadd.s32 %v189_v30, %v185_v28  ;;  %vm171_vm8 = vc.u32 %v163_v35, %v167_v40  ;;  %v173_v52 = vadd.s32 %v167_v40, %v163_v35 }
  0x37   :  { %v194_v62 = vsel %vm193_vm7, 1, %v1317_v61  ;;  %v172_v0 = vsel %vm171_vm8, 1, %v1317_v61  ;;  %v288_v16 = vshrl.u32 %v1311_v34, %v1446_v49  ;;  %v292_v19 = vor.u32 %v291_v4, %v290_v1 }
  0x38   :  { %vm197_vm9 = vc.u32 %v1444_v48, %v191_v47  ;;  %vm175_vm10 = vc.u32 %v173_v52, %v169_v51  ;;  %v196_v8 = vadd.s32 %v194_v62, %v188_v55  ;;  %v174_v13 = vadd.s32 %v172_v0, %v166_v57 }
  0x39   :  { %v198_v14 = vsel %vm197_vm9, 1, %v1317_v61  ;;  %v176_v18 = vsel %vm175_vm10, 1, %v1317_v61  ;;  %v293_v20 = vshll.u32 %v1312_v36, %v278_v32  ;;  %v294_v21 = vshrl.u32 %v1313_v41, %v1446_v49 }
  0x3a   :  { %v77_v24 = vfloor.f32 %v71_v56  ;;  %v271_v26 = vand.u32 8388607, %v2386_v63  ;;  %vm299_vm11 = vcmp.lt.s32.totalorder %v1461_v5, 4  ;;  %v428_v28 = vadd.s32 1, %v1143_v7 }
  0x3b   :  { %v66_v30 = vcvt.s32.f32 %v1450_v54  ;;  %v190_v35 = vshrl.u32 %v1425_v22, 16  ;;  %v200_v40 = vadd.s32 %v198_v14, %v196_v8  ;;  %v1482_v42 = vor.u32 %v282_v10, %v281_v6 }
  0x3c   :  { %v168_v43 = vshrl.u32 %v1429_v25, 16  ;;  %v178_v32 = vadd.s32 %v176_v18, %v174_v13  ;;  %v1485_v45 = vor.u32 %v285_v12, %v284_v11  ;;  %v1487_v51 = vor.u32 %v288_v16, %v287_v15 }
  0x3d   :  { %v295_v52 = vor.u32 %v294_v21, %v293_v20  ;;  %vm296_vm12 = vcmp.lt.s32.totalorder %v1461_v5, 1  ;;  %vm298_vm13 = vcmp.lt.s32.totalorder %v1461_v5, 3  ;;  %v305_v53 = vsel %vm299_vm11, %v292_v19, 920167782 }
  0x3e   :  { %v1163_v55 = vcvt.f32.s32 %v77_v24  ;;  %v126_v22 = vshrl.u32 %v1314_v44, %v1364_v31  ;;  %v272_v56 = vor.u32 8388608, %v271_v26  ;;  %vm429_vm14 = vcmp.gt.s32.totalorder %v428_v28, 0 }
  0x3f   :  { %v147_v25 = vsel %vm145_vm2, %v1394_v60, 2102212464  ;;  %v170_v57 = vshrl.u32 %v1437_v37, 16  ;;  %v192_v62 = vshrl.u32 %v1434_v29, 16  ;;  %v201_v0 = vadd.s32 %v200_v40, %v190_v35 }
  0x40   :  { %v179_v1 = vadd.s32 %v178_v32, %v168_v43  ;;  %vm297_vm15 = vcmp.lt.s32.totalorder %v1461_v5, 2  ;;  %v304_v4 = vsel %vm296_vm12, %v1482_v42, %v1485_v45  ;;  %v306_v31 = vsel %vm298_vm13, %v1487_v51, %v305_v53 }
  0x41   :  { %v309_v60 = vsel %vm299_vm11, %v295_v52, 1326507024  ;;  %v430_v6 = vsel %vm429_vm14, %v428_v28, 0  ;;  %v72_v37 = vmul.f32 0.020833334, %v66_v30  ;;  %v89_v7 = vmul.u32 48, %v1163_v55 }
  0x42   :  { %v146_v8 = vsel %vm142_vm3, %v126_v22, %v1390_v58  ;;  %v1513_v10 = vshll.u32 %v272_v56, 8  ;;  %v148_v11 = vsel %vm144_vm4, %v1392_v59, %v147_v25  ;;  %v1521_v12 = vadd.s32 %v1444_v48, %v191_v47 }
  0x43   :  { %v202_v13 = vadd.s32 %v201_v0, %v192_v62  ;;  %v307_v14 = vsel %vm297_vm15, %v304_v4, %v306_v31  ;;  %v1525_v15 = vadd.s32 %v179_v1, %v170_v57  ;;  %v308_v58 = vsel %vm296_vm12, %v1485_v45, %v1487_v51 }
  0x44   :  { %v310_v16 = vsel %vm298_vm13, %v292_v19, %v309_v60  ;;  %v432_v59 = vand.u32 31, %v430_v6  ;;  %v78_v18 = vfloor.f32 %v72_v37  ;;  %v313_v29 = vand.u32 65535, %v1513_v10 }
  0x45   :  { %v338_v47 = vshrl.u32 %v307_v14, 16  ;;  %v95_v48 = vsub.s32 %v1432_v27, %v89_v7  ;;  %v149_v20 = vsel %vm143_vm5, %v146_v8, %v148_v11  ;;  %v206_v21 = vadd.s32 1, %v202_v13 }
  0x46   :  { %v311_v24 = vsel %vm297_vm15, %v308_v58, %v310_v16  ;;  %vm205_vm1 = vc.u32 %v1525_v15, %v1521_v12  ;;  %v1541_v26 = vsub.s32 32, %v432_v59  ;;  %v337_v19 = vand.u32 65535, %v307_v14 }
  0x47   :  { %v203_v28 = vmul.u32 %v1416_v9, %v149_v20  ;;  %v314_v30 = vshrl.u32 %v1513_v10, 16  ;;  %v316_v35 = vshrl.u32 %v311_v24, 16  ;;  %v1545_v40 = vmul.u32 %v338_v47, %v313_v29 }
  0x48   :  { %v44_v39 = vadd.s32 40, %v1351_v2  ;;  %v1548_v27 = vcvt.f32.s32 %v78_v18  ;;  %v101_v43 = vcvt.s32.f32 %v95_v48  ;;  %v207_v32 = vsel %vm205_vm1, %v206_v21, %v202_v13 }
  0x49   :  { %v315_v52 = vand.u32 65535, %v311_v24  ;;  %v2385_v53 = vand.u32 2147483647, %v1427_v23  ;;  %v447_v55 = vshll.u32 %v1312_v36, %v432_v59  ;;  %v448_v22 = vshrl.u32 %v1313_v41, %v1541_v26 }
  0x4a   :  { %v339_v9 = vmul.u32 %v337_v19, %v313_v29  ;;  %v1554_v56 = vshrl.u32 %v430_v6, 5  ;;  %v444_v25 = vshll.u32 %v1311_v34, %v432_v59  ;;  %v445_v2 = vshrl.u32 %v1312_v36, %v1541_v26 }
  0x4b   :  { %v1559_v57 = vadd.s32 %v207_v32, %v203_v28  ;;  %v1561_v62 = vmul.u32 %v316_v35, %v313_v29  ;;  %v1563_v0 = vmul.u32 %v337_v19, %v314_v30  ;;  %v343_v1 = vshll.u32 %v1545_v40, 16 }
  0x4c   :  { %v438_v4 = vshll.u32 %v1315_v46, %v432_v59  ;;  %v439_v31 = vshrl.u32 %v1316_v50, %v1541_v26  ;;  %v441_v60 = vshll.u32 %v1316_v50, %v432_v59  ;;  %v442_v6 = vshrl.u32 %v1311_v34, %v1541_v26 }
  0x4d   :  { %v425_v37 = vand.u32 8388607, %v2385_v53  ;;  %v435_v7 = vshll.u32 %v1314_v44, %v432_v59  ;;  %v436_v8 = vshrl.u32 %v1315_v46, %v1541_v26  ;;  %v449_v11 = vor.u32 %v448_v22, %v447_v55 }
  0x4e   :  { %v317_v13 = vmul.u32 %v315_v52, %v313_v29  ;;  %v1577_v14 = vmul.u32 %v315_v52, %v314_v30  ;;  %v446_v58 = vor.u32 %v445_v2, %v444_v25  ;;  %vm453_vm2 = vcmp.lt.s32.totalorder %v1554_v56, 4 }
  0x4f   :  { %v321_v16 = vshll.u32 %v1561_v62, 16  ;;  %v345_v18 = vshll.u32 %v1563_v0, 16  ;;  %vm347_vm3 = vc.u32 %v339_v9, %v343_v1  ;;  %v1582_v48 = vadd.s32 %v343_v1, %v339_v9 }
  0x50   :  { %v209_v20 = vadd.s32 536870912, %v1559_v57  ;;  %v342_v59 = vmul.u32 %v338_v47, %v314_v30  ;;  %v1585_v21 = vor.u32 %v439_v31, %v438_v4  ;;  %v1587_v24 = vor.u32 %v442_v6, %v441_v60 }
  0x51   :  { %v1589_v29 = vor.u32 %v436_v8, %v435_v7  ;;  %vm450_vm4 = vcmp.lt.s32.totalorder %v1554_v56, 1  ;;  %vm452_vm5 = vcmp.lt.s32.totalorder %v1554_v56, 3  ;;  %v463_v19 = vsel %vm453_vm2, %v449_v11, 1326507024 }
  0x52   :  { %v1595_v28 = vmul.f32 0.1308997, %v101_v43  ;;  %v348_v32 = vsel %vm347_vm3, 1, %v1317_v61  ;;  %v426_v52 = vor.u32 8388608, %v425_v37  ;;  %v459_v47 = vsel %vm453_vm2, %v446_v58, 920167782 }
  0x53   :  { %v323_v55 = vshll.u32 %v1577_v14, 16  ;;  %vm325_vm6 = vc.u32 %v317_v13, %v321_v16  ;;  %v327_v22 = vadd.s32 %v321_v16, %v317_v13  ;;  %vm351_vm7 = vc.u32 %v1582_v48, %v345_v18 }
  0x54   :  { %v1604_v9 = vshrl.u32 %v209_v20, 30  ;;  %vm451_vm8 = vcmp.lt.s32.totalorder %v1554_v56, 2  ;;  %v462_v43 = vsel %vm450_vm4, %v1585_v21, %v1587_v24  ;;  %v464_v25 = vsel %vm452_vm5, %v446_v58, %v463_v19 }
  0x55   :  { %v320_v2 = vmul.u32 %v316_v35, %v314_v30  ;;  %v350_v1 = vadd.s32 %v348_v32, %v342_v59  ;;  %v458_v4 = vsel %vm450_vm4, %v1589_v29, %v1585_v21  ;;  %v460_v31 = vsel %vm452_vm5, %v1587_v24, %v459_v47 }
  0x56   :  { %v1621_v60 = vmul.u32 %v1353_v3, %v44_v39  ;;  %v326_v6 = vsel %vm325_vm6, 1, %v1317_v61  ;;  %v352_v37 = vsel %vm351_vm7, 1, %v1317_v61  ;;  %v1625_v7 = vshll.u32 %v426_v52, 8 }
  0x57   :  { %v90_v30 = vmul.u32 48, %v1548_v27  ;;  %vm329_vm9 = vc.u32 %v327_v22, %v323_v55  ;;  %v1630_v35 = vsel %vm451_vm8, %v462_v43, %v464_v25  ;;  %v211_v8 = vshll.u32 %v1604_v9, 30 }
  0x58   :  { %v1635_v11 = vsel %vm451_vm8, %v458_v4, %v460_v31  ;;  %v328_v3 = vadd.s32 %v326_v6, %v320_v2  ;;  %v344_v39 = vshrl.u32 %v1545_v40, 16  ;;  %v354_v13 = vadd.s32 %v352_v37, %v350_v1 }
  0x59   :  { %v575_v58 = vand.u32 2139095040, %v1595_v28  ;;  %v67_v16 = vcvt.s32.f32 %v1621_v60  ;;  %v330_v27 = vsel %vm329_vm9, 1, %v1317_v61  ;;  %v467_v20 = vand.u32 65535, %v1625_v7 }
  0x5a   :  { %v470_v59 = vshrl.u32 %v1630_v35, 16  ;;  %v96_v19 = vsub.s32 %v1450_v54, %v90_v30  ;;  %v280_v32 = vshrl.u32 %v1314_v44, %v1446_v49  ;;  %v492_v52 = vshrl.u32 %v1635_v11, 16 }
  0x5b   :  { %v576_v47 = vshrl.u32 %v575_v58, 23  ;;  %v1648_v40 = vsub.s32 %v1559_v57, %v211_v8  ;;  %v301_v55 = vsel %vm299_vm11, %v1487_v51, 2102212464  ;;  %v322_v22 = vshrl.u32 %v1561_v62, 16 }
  0x5c   :  { %v346_v43 = vshrl.u32 %v1563_v0, 16  ;;  %v332_v25 = vadd.s32 %v330_v27, %v328_v3  ;;  %v355_v2 = vadd.s32 %v354_v13, %v344_v39  ;;  %v469_v54 = vand.u32 65535, %v1630_v35 }
  0x5d   :  { %v1146_v1 = vadd.s32 4294967169, %v576_v47  ;;  %v1656_v49 = vmul.f32 0.020833334, %v67_v16  ;;  %v468_v4 = vshrl.u32 %v1625_v7, 16  ;;  %v1659_v31 = vmul.u32 %v470_v59, %v467_v20 }
  0x5e   :  { %v491_v57 = vand.u32 65535, %v1635_v11  ;;  %v102_v6 = vcvt.s32.f32 %v96_v19  ;;  %v300_v51 = vsel %vm296_vm12, %v280_v32, %v1482_v42  ;;  %v1665_v62 = vmul.u32 %v492_v52, %v467_v20 }
  0x5f   :  { %v582_v37 = vadd.s32 1, %v1146_v1  ;;  %vm213_vm10 = vcmp.lt.s32.totalorder %v1648_v40, 0  ;;  %v214_v30 = vsub.s32 0, %v1648_v40  ;;  %v302_v35 = vsel %vm298_vm13, %v1485_v45, %v301_v55 }
  0x60   :  { %v324_v8 = vshrl.u32 %v1577_v14, 16  ;;  %v333_v3 = vadd.s32 %v332_v25, %v322_v22  ;;  %v1673_v11 = vadd.s32 %v355_v2, %v346_v43  ;;  %v471_v39 = vmul.u32 %v469_v54, %v467_v20 }
  0x61   :  { %vm583_vm11 = vcmp.gt.s32.totalorder %v582_v37, 0  ;;  %v1675_v13 = vmul.u32 %v469_v54, %v468_v4  ;;  %v475_v42 = vshll.u32 %v1659_v31, 16  ;;  %v493_v58 = vmul.u32 %v491_v57, %v467_v20 }
  0x62   :  { %v584_v16 = vsel %vm583_vm11, %v582_v37, 0  ;;  %v1678_v27 = vmul.u32 %v491_v57, %v468_v4  ;;  %v497_v19 = vshll.u32 %v1665_v62, 16  ;;  %v2384_v32 = vand.u32 2147483647, %v1595_v28 }
  0x63   :  { %v586_v45 = vand.u32 31, %v584_v16  ;;  %v79_v14 = vfloor.f32 %v1656_v49  ;;  %v1683_v47 = vmul.f32 0.1308997, %v102_v6  ;;  %v1688_v55 = vsel %vm213_vm10, %v214_v30, %v1648_v40 }
  0x64   :  { %v303_v20 = vsel %vm297_vm15, %v300_v51, %v302_v35  ;;  %v1695_v22 = vadd.s32 %v1582_v48, %v345_v18  ;;  %v1699_v25 = vadd.s32 %v333_v3, %v324_v8  ;;  %v360_v2 = vadd.s32 1, %v1673_v11 }
  0x65   :  { %v1697_v43 = vsub.s32 32, %v586_v45  ;;  %v477_v54 = vshll.u32 %v1675_v13, 16  ;;  %vm1703_vm12 = vc.u32 %v471_v39, %v475_v42  ;;  %v481_v57 = vadd.s32 %v475_v42, %v471_v39 }
  0x66   :  { %v499_v5 = vshll.u32 %v1678_v27, 16  ;;  %vm1708_vm13 = vc.u32 %v493_v58, %v497_v19  ;;  %v579_v18 = vand.u32 8388607, %v2384_v32  ;;  %v589_v48 = vshll.u32 %v1314_v44, %v586_v45 }
  0x67   :  { %v590_v6 = vshrl.u32 %v1315_v46, %v1697_v43  ;;  %v592_v51 = vshll.u32 %v1315_v46, %v586_v45  ;;  %v593_v37 = vshrl.u32 %v1316_v50, %v1697_v43  ;;  %v1720_v30 = vadd.s32 %v497_v19, %v493_v58 }
  0x68   :  { %v1722_v35 = vshrl.u32 %v584_v16, 5  ;;  %v598_v8 = vshll.u32 %v1311_v34, %v586_v45  ;;  %v599_v3 = vshrl.u32 %v1312_v36, %v1697_v43  ;;  %v474_v39 = vmul.u32 %v470_v59, %v468_v4 }
  0x69   :  { %v496_v42 = vmul.u32 %v492_v52, %v468_v4  ;;  %v595_v32 = vshll.u32 %v1316_v50, %v586_v45  ;;  %v596_v53 = vshrl.u32 %v1311_v34, %v1697_v43  ;;  %v480_v63 = vsel %vm1703_vm12, 1, %v1317_v61 }
  0x6a   :  { %vm1733_vm14 = vc.u32 %v481_v57, %v477_v54  ;;  %v601_v16 = vshll.u32 %v1312_v36, %v586_v45  ;;  %v602_v19 = vshrl.u32 %v1313_v41, %v1697_v43  ;;  %v502_v59 = vsel %vm1708_vm13, 1, %v1317_v61 }
  0x6b   :  { %v580_v52 = vor.u32 8388608, %v579_v18  ;;  %v1743_v4 = vor.u32 %v590_v6, %v589_v48  ;;  %v1745_v38 = vor.u32 %v593_v37, %v592_v51  ;;  %vm505_vm15 = vc.u32 %v1720_v30, %v499_v5 }
  0x6c   :  { %v600_v54 = vor.u32 %v599_v3, %v598_v8  ;;  %v603_v1 = vor.u32 %v602_v19, %v601_v16  ;;  %vm604_vm1 = vcmp.lt.s32.totalorder %v1722_v35, 1  ;;  %vm359_vm3 = vc.u32 %v1699_v25, %v1695_v22 }
  0x6d   :  { %v482_v45 = vadd.s32 %v480_v63, %v474_v39  ;;  %v1753_v57 = vor.u32 %v596_v53, %v595_v32  ;;  %vm607_vm6 = vcmp.lt.s32.totalorder %v1722_v35, 4  ;;  %v357_v0 = vmul.u32 %v1513_v10, %v303_v20 }
  0x6e   :  { %v484_v18 = vsel %vm1733_vm14, 1, %v1317_v61  ;;  %v504_v48 = vadd.s32 %v502_v59, %v496_v42  ;;  %vm606_vm7 = vcmp.lt.s32.totalorder %v1722_v35, 3  ;;  %v506_v6 = vsel %vm505_vm15, 1, %v1317_v61 }
  0x6f   :  { %vm605_vm9 = vcmp.lt.s32.totalorder %v1722_v35, 2  ;;  %v612_v63 = vsel %vm604_vm1, %v1743_v4, %v1745_v38  ;;  %v1767_v53 = vshll.u32 %v580_v52, 8  ;;  %v216_v10 = vclz %v1688_v55 }
  0x70   :  { %v361_v32 = vsel %vm359_vm3, %v360_v2, %v1673_v11  ;;  %v613_v20 = vsel %vm607_vm6, %v600_v54, 920167782  ;;  %v617_v51 = vsel %vm607_vm6, %v603_v1, 1326507024  ;;  %v476_v37 = vshrl.u32 %v1659_v31, 16 }
  0x71   :  { %v486_v8 = vadd.s32 %v484_v18, %v482_v45  ;;  %v614_v3 = vsel %vm606_vm7, %v1753_v57, %v613_v20  ;;  %v616_v55 = vsel %vm604_vm1, %v1745_v38, %v1753_v57  ;;  %v498_v11 = vshrl.u32 %v1665_v62, 16 }
  0x72   :  { %v508_v2 = vadd.s32 %v506_v6, %v504_v48  ;;  %v615_v39 = vsel %vm605_vm9, %v612_v63, %v614_v3  ;;  %v618_v42 = vsel %vm606_vm7, %v600_v54, %v617_v51  ;;  %v1788_v31 = vadd.s32 %v361_v32, %v357_v0 }
  0x73   :  { %v434_v58 = vshrl.u32 %v1314_v44, %v1541_v26  ;;  %v455_v16 = vsel %vm453_vm2, %v1587_v24, 2102212464  ;;  %v621_v19 = vand.u32 65535, %v1767_v53  ;;  %v619_v62 = vsel %vm605_vm9, %v616_v55, %v618_v42 }
  0x74   :  { %v622_v59 = vshrl.u32 %v1767_v53, 16  ;;  %v646_v52 = vshrl.u32 %v615_v39, 16  ;;  %v729_v1 = vand.u32 2139095040, %v1683_v47  ;;  %v1800_v54 = vadd.s32 4294967294, %v216_v10 }
  0x75   :  { %v478_v45 = vshrl.u32 %v1675_v13, 16  ;;  %v487_v0 = vadd.s32 %v486_v8, %v476_v37  ;;  %v645_v26 = vand.u32 65535, %v615_v39  ;;  %v500_v18 = vshrl.u32 %v1678_v27, 16 }
  0x76   :  { %v509_v48 = vadd.s32 %v508_v2, %v498_v11  ;;  %v623_v24 = vand.u32 65535, %v619_v62  ;;  %v624_v6 = vshrl.u32 %v619_v62, 16  ;;  %v363_v63 = vadd.s32 536870912, %v1788_v31 }
  0x77   :  { %v454_v32 = vsel %vm450_vm4, %v434_v58, %v1589_v29  ;;  %v456_v10 = vsel %vm452_vm5, %v1585_v21, %v455_v16  ;;  %v648_v20 = vmul.u32 %v646_v52, %v621_v19  ;;  %v730_v8 = vshrl.u32 %v729_v1, 23 }
  0x78   :  { %v625_v51 = vmul.u32 %v623_v24, %v621_v19  ;;  %v626_v13 = vmul.u32 %v624_v6, %v621_v19  ;;  %v627_v37 = vmul.u32 %v623_v24, %v622_v59  ;;  %v1811_v3 = vadd.s32 %v487_v0, %v478_v45 }
  0x79   :  { %v1816_v55 = vadd.s32 %v1720_v30, %v499_v5  ;;  %v647_v11 = vmul.u32 %v645_v26, %v621_v19  ;;  %v649_v2 = vmul.u32 %v645_v26, %v622_v59  ;;  %v510_v39 = vadd.s32 %v509_v48, %v500_v18 }
  0x7a   :  { %v628_v29 = vmul.u32 %v624_v6, %v622_v59  ;;  %v629_v42 = vshll.u32 %v626_v13, 16  ;;  %v631_v58 = vshll.u32 %v627_v37, 16  ;;  %v1818_v62 = vshrl.u32 %v363_v63, 30 }
  0x7b   :  { %v457_v21 = vsel %vm451_vm8, %v454_v32, %v456_v10  ;;  %v650_v16 = vmul.u32 %v646_v52, %v622_v59  ;;  %v651_v1 = vshll.u32 %v648_v20, 16  ;;  %v653_v0 = vshll.u32 %v649_v2, 16 }
  0x7c   :  { %vm633_vm2 = vc.u32 %v625_v51, %v629_v42  ;;  %v635_v45 = vadd.s32 %v629_v42, %v625_v51  ;;  %v1149_v27 = vadd.s32 4294967169, %v730_v8  ;;  %vm513_vm4 = vc.u32 %v1811_v3, %v1816_v55 }
  0x7d   :  { %v634_v5 = vsel %vm633_vm2, 1, %v1317_v61  ;;  %vm655_vm5 = vc.u32 %v647_v11, %v651_v1  ;;  %v657_v30 = vadd.s32 %v651_v1, %v647_v11  ;;  %v514_v19 = vadd.s32 1, %v510_v39 }
  0x7e   :  { %v636_v26 = vadd.s32 %v634_v5, %v628_v29  ;;  %vm637_vm10 = vc.u32 %v635_v45, %v631_v58  ;;  %v656_v18 = vsel %vm655_vm5, 1, %v1317_v61  ;;  %v630_v56 = vshrl.u32 %v626_v13, 16 }
  0x7f   :  { %v638_v59 = vsel %vm637_vm10, 1, %v1317_v61  ;;  %v658_v52 = vadd.s32 %v656_v18, %v650_v16  ;;  %vm659_vm8 = vc.u32 %v657_v30, %v653_v0  ;;  %v652_v24 = vshrl.u32 %v648_v20, 16 }
  0x80   :  { %v640_v48 = vadd.s32 %v638_v59, %v636_v26  ;;  %v660_v6 = vsel %vm659_vm8, 1, %v1317_v61  ;;  %v736_v63 = vadd.s32 1, %v1149_v27  ;;  %v1167_v32 = vcvt.f32.s32 %v79_v14 }
  0x81   :  { %vm1139_vm11 = vcmp.lt.s32.totalorder %v1800_v54, 0  ;;  %v662_v10 = vadd.s32 %v660_v6, %v658_v52  ;;  %v365_v51 = vshll.u32 %v1818_v62, 30  ;;  %v511_v8 = vmul.u32 %v1625_v7, %v457_v21 }
  0x82   :  { %v2389_v13 = vand.u32 2147483647, %v1683_v47  ;;  %vm737_vm12 = vcmp.gt.s32.totalorder %v736_v63, 0  ;;  %v515_v20 = vsel %vm513_vm4, %v514_v19, %v510_v39  ;;  %v588_v11 = vshrl.u32 %v1314_v44, %v1697_v43 }
  0x83   :  { %v632_v29 = vshrl.u32 %v627_v37, 16  ;;  %v738_v49 = vsel %vm737_vm12, %v736_v63, 0  ;;  %v641_v14 = vadd.s32 %v640_v48, %v630_v56  ;;  %v654_v42 = vshrl.u32 %v649_v2, 16 }
  0x84   :  { %v663_v58 = vadd.s32 %v662_v10, %v652_v24  ;;  %v740_v16 = vand.u32 31, %v738_v49  ;;  %v609_v7 = vsel %vm607_vm6, %v1753_v57, 2102212464  ;;  %v1843_v21 = vsub.s32 %v1788_v31, %v365_v51 }
  0x85   :  { %v733_v1 = vand.u32 8388607, %v2389_v13  ;;  %v91_v45 = vmul.u32 48, %v1167_v32  ;;  %v1852_v43 = vsel %vm1139_vm11, 0, %v1800_v54  ;;  %v1854_v37 = vadd.s32 %v515_v20, %v511_v8 }
  0x86   :  { %v1847_v39 = vsub.s32 32, %v740_v16  ;;  %v608_v57 = vsel %vm604_vm1, %v588_v11, %v1743_v4  ;;  %v610_v31 = vsel %vm606_vm7, %v1745_v38, %v609_v7  ;;  %v1862_v2 = vadd.s32 %v641_v14, %v632_v29 }
  0x87   :  { %v1864_v27 = vadd.s32 %v657_v30, %v653_v0  ;;  %v664_v5 = vadd.s32 %v663_v58, %v654_v42  ;;  %v743_v19 = vshll.u32 %v1314_v44, %v740_v16  ;;  %v746_v26 = vshll.u32 %v1315_v46, %v740_v16 }
  0x88   :  { %v744_v54 = vshrl.u32 %v1315_v46, %v1847_v39  ;;  %v747_v18 = vshrl.u32 %v1316_v50, %v1847_v39  ;;  %vm367_vm13 = vcmp.lt.s32.totalorder %v1843_v21, 0  ;;  %v368_v4 = vsub.s32 0, %v1843_v21 }
  0x89   :  { %v734_v38 = vor.u32 8388608, %v733_v1  ;;  %v1874_v56 = vshrl.u32 %v738_v49, 5  ;;  %v517_v0 = vadd.s32 536870912, %v1854_v37  ;;  %v749_v30 = vshll.u32 %v1316_v50, %v740_v16 }
  0x8a   :  { %v750_v59 = vshrl.u32 %v1311_v34, %v1847_v39  ;;  %v752_v52 = vshll.u32 %v1311_v34, %v740_v16  ;;  %v611_v48 = vsel %vm605_vm9, %v608_v57, %v610_v31  ;;  %vm667_vm14 = vc.u32 %v1862_v2, %v1864_v27 }
  0x8b   :  { %v668_v24 = vadd.s32 1, %v664_v5  ;;  %v753_v6 = vshrl.u32 %v1312_v36, %v1847_v39  ;;  %v1887_v63 = vor.u32 %v744_v54, %v743_v19  ;;  %v1889_v32 = vor.u32 %v747_v18, %v746_v26 }
  0x8c   :  { %v755_v10 = vshll.u32 %v1312_v36, %v740_v16  ;;  %v756_v51 = vshrl.u32 %v1313_v41, %v1847_v39  ;;  %v97_v8 = vsub.s32 %v1621_v60, %v91_v45  ;;  %vm758_vm15 = vcmp.lt.s32.totalorder %v1874_v56, 1 }
  0x8d   :  { %v754_v35 = vor.u32 %v753_v6, %v752_v52  ;;  %v224_v20 = vsub.s32 4294967266, %v1852_v43  ;;  %v665_v11 = vmul.u32 %v1767_v53, %v611_v48  ;;  %v1898_v29 = vor.u32 %v750_v59, %v749_v30 }
  0x8e   :  { %vm761_vm1 = vcmp.lt.s32.totalorder %v1874_v56, 4  ;;  %v369_v49 = vsel %vm367_vm13, %v368_v4, %v1843_v21  ;;  %v1904_v14 = vshrl.u32 %v517_v0, 30  ;;  %v669_v60 = vsel %vm667_vm14, %v668_v24, %v664_v5 }
  0x8f   :  { %vm760_vm3 = vcmp.lt.s32.totalorder %v1874_v56, 3  ;;  %v757_v42 = vor.u32 %v756_v51, %v755_v10  ;;  %vm759_vm6 = vcmp.lt.s32.totalorder %v1874_v56, 2  ;;  %v766_v53 = vsel %vm758_vm15, %v1887_v63, %v1889_v32 }
  0x90   :  { %v1915_v58 = vshll.u32 %v734_v38, 8  ;;  %v103_v16 = vcvt.s32.f32 %v97_v8  ;;  %v767_v7 = vsel %vm761_vm1, %v754_v35, 920167782  ;;  %v370_v1 = vclz %v369_v49 }
  0x91   :  { %v670_v45 = vadd.s32 %v669_v60, %v665_v11  ;;  %v768_v57 = vsel %vm760_vm3, %v1898_v29, %v767_v7  ;;  %v204_v31 = vadd.s32 %v1521_v12, %v1525_v15  ;;  %v220_v5 = vsub.s32 32, %v1852_v43 }
  0x92   :  { %v769_v19 = vsel %vm759_vm6, %v766_v53, %v768_v57  ;;  %v770_v54 = vsel %vm758_vm15, %v1889_v32, %v1898_v29  ;;  %v225_v26 = vadd.s32 127, %v224_v20  ;;  %v519_v18 = vshll.u32 %v1904_v14, 30 }
  0x93   :  { %v771_v4 = vsel %vm761_vm1, %v757_v42, 1326507024  ;;  %v775_v38 = vand.u32 65535, %v1915_v58  ;;  %v1935_v0 = vmul.f32 0.1308997, %v103_v16  ;;  %v776_v15 = vshrl.u32 %v1915_v58, 16 }
  0x94   :  { %v772_v12 = vsel %vm760_vm3, %v754_v35, %v771_v4  ;;  %v800_v30 = vshrl.u32 %v769_v19, 16  ;;  %v221_v59 = vshll.u32 %v1648_v40, %v1852_v43  ;;  %v1141_v52 = vadd.s32 4294967294, %v370_v1 }
  0x95   :  { %v671_v48 = vadd.s32 536870912, %v670_v45  ;;  %v773_v24 = vsel %vm759_vm6, %v770_v54, %v772_v12  ;;  %v222_v6 = vshrl.u32 %v204_v31, %v220_v5  ;;  %v799_v8 = vand.u32 65535, %v769_v19 }
  0x96   :  { %v777_v10 = vand.u32 65535, %v773_v24  ;;  %v778_v51 = vshrl.u32 %v773_v24, 16  ;;  %v226_v20 = vshll.u32 %v225_v26, 23  ;;  %v1945_v11 = vsub.s32 %v1854_v37, %v519_v18 }
  0x97   :  { %v802_v35 = vmul.u32 %v800_v30, %v775_v38  ;;  %v883_v53 = vand.u32 2139095040, %v1935_v0  ;;  %vm1142_vm7 = vcmp.lt.s32.totalorder %v1141_v52, 0  ;;  %v1948_v40 = vshrl.u32 %v671_v48, 30 }
  0x98   :  { %v779_v49 = vmul.u32 %v777_v10, %v775_v38  ;;  %v780_v60 = vmul.u32 %v778_v51, %v775_v38  ;;  %v781_v42 = vmul.u32 %v777_v10, %v776_v15  ;;  %v1950_v43 = vor.u32 %v222_v6, %v221_v59 }
  0x99   :  { %v782_v16 = vmul.u32 %v778_v51, %v776_v15  ;;  %v803_v1 = vmul.u32 %v799_v8, %v776_v15  ;;  %v1952_v57 = vor.u32 4788187, %v226_v20  ;;  %v801_v5 = vmul.u32 %v799_v8, %v775_v38 }
  0x9a   :  { %v783_v7 = vshll.u32 %v780_v60, 16  ;;  %v785_v31 = vshll.u32 %v781_v42, 16  ;;  %v805_v37 = vshll.u32 %v802_v35, 16  ;;  %v1954_v19 = vsel %vm1142_vm7, 0, %v1141_v52 }
  0x9b   :  { %vm521_vm9 = vcmp.lt.s32.totalorder %v1945_v11, 0  ;;  %v884_v54 = vshrl.u32 %v883_v53, 23  ;;  %v673_v26 = vshll.u32 %v1948_v40, 30  ;;  %v804_v12 = vmul.u32 %v800_v30, %v776_v15 }
  0x9c   :  { %vm787_vm2 = vc.u32 %v779_v49, %v783_v7  ;;  %v789_v4 = vadd.s32 %v783_v7, %v779_v49  ;;  %v522_v59 = vsub.s32 0, %v1945_v11  ;;  %v742_v48 = vshrl.u32 %v1314_v44, %v1847_v39 }
  0x9d   :  { %v788_v18 = vsel %vm787_vm2, 1, %v1317_v61  ;;  %v807_v38 = vshll.u32 %v803_v1, 16  ;;  %v763_v52 = vsel %vm761_vm1, %v1898_v29, 2102212464  ;;  %v784_v6 = vshrl.u32 %v780_v60, 16 }
  0x9e   :  { %v790_v24 = vadd.s32 %v788_v18, %v782_v16  ;;  %vm791_vm4 = vc.u32 %v789_v4, %v785_v31  ;;  %vm809_vm5 = vc.u32 %v801_v5, %v805_v37  ;;  %v811_v8 = vadd.s32 %v805_v37, %v801_v5 }
  0x9f   :  { %v792_v10 = vsel %vm791_vm4, 1, %v1317_v61  ;;  %v810_v51 = vsel %vm809_vm5, 1, %v1317_v61  ;;  %v1152_v15 = vadd.s32 4294967169, %v884_v54  ;;  %v1967_v30 = vsub.s32 %v670_v45, %v673_v26 }
  0xa0   :  { %v786_v20 = vshrl.u32 %v781_v42, 16  ;;  %v794_v49 = vadd.s32 %v792_v10, %v790_v24  ;;  %v812_v39 = vadd.s32 %v810_v51, %v804_v12  ;;  %v523_v53 = vsel %vm521_vm9, %v522_v59, %v1945_v11 }
  0xa1   :  { %v806_v16 = vshrl.u32 %v802_v35, 16  ;;  %vm813_vm10 = vc.u32 %v811_v8, %v807_v38  ;;  %v890_v29 = vadd.s32 1, %v1152_v15  ;;  %v762_v60 = vsel %vm758_vm15, %v742_v48, %v1887_v63 }
  0xa2   :  { %v764_v7 = vsel %vm760_vm3, %v1889_v32, %v763_v52  ;;  %v795_v45 = vadd.s32 %v794_v49, %v784_v6  ;;  %v814_v42 = vsel %vm813_vm10, 1, %v1317_v61  ;;  %v808_v31 = vshrl.u32 %v803_v1, 16 }
  0xa3   :  { %v816_v5 = vadd.s32 %v814_v42, %v812_v39  ;;  %v2388_v37 = vand.u32 2147483647, %v1935_v0  ;;  %vm891_vm8 = vcmp.gt.s32.totalorder %v890_v29, 0  ;;  %v676_v35 = vsub.s32 0, %v1967_v30 }
  0xa4   :  { %v1981_v54 = vadd.s32 %v795_v45, %v786_v20  ;;  %v1983_v26 = vadd.s32 %v811_v8, %v807_v38  ;;  %v892_v18 = vsel %vm891_vm8, %v890_v29, 0  ;;  %vm675_vm11 = vcmp.lt.s32.totalorder %v1967_v30, 0 }
  0xa5   :  { %v765_v63 = vsel %vm759_vm6, %v762_v60, %v764_v7  ;;  %v817_v32 = vadd.s32 %v816_v5, %v806_v16  ;;  %v894_v4 = vand.u32 31, %v892_v18  ;;  %v228_v1 = vand.u32 2147483647, %v1952_v57 }
  0xa6   :  { %v230_v12 = vcvt.s32.f32 %v1950_v43  ;;  %v358_v59 = vadd.s32 %v1695_v22, %v1699_v25  ;;  %v378_v48 = vsub.s32 4294967266, %v1954_v19  ;;  %v524_v24 = vclz %v523_v53 }
  0xa7   :  { %v818_v38 = vadd.s32 %v817_v32, %v808_v31  ;;  %v1993_v52 = vsub.s32 32, %v894_v4  ;;  %v677_v6 = vsel %vm675_vm11, %v676_v35, %v1967_v30  ;;  %v819_v56 = vmul.u32 %v1915_v58, %v765_v63 }
  0xa8   :  { %vm821_vm12 = vc.u32 %v1981_v54, %v1983_v26  ;;  %v887_v57 = vand.u32 8388607, %v2388_v37  ;;  %v2001_v10 = vshrl.u32 %v892_v18, 5  ;;  %v897_v22 = vshll.u32 %v1314_v44, %v894_v4 }
  0xa9   :  { %v822_v43 = vadd.s32 1, %v818_v38  ;;  %v906_v25 = vshll.u32 %v1311_v34, %v894_v4  ;;  %v898_v51 = vshrl.u32 %v1315_v46, %v1993_v52  ;;  %v900_v8 = vshll.u32 %v1315_v46, %v894_v4 }
  0xaa   :  { %v903_v58 = vshll.u32 %v1316_v50, %v894_v4  ;;  %v909_v15 = vshll.u32 %v1312_v36, %v894_v4  ;;  %v901_v49 = vshrl.u32 %v1316_v50, %v1993_v52  ;;  %v904_v39 = vshrl.u32 %v1311_v34, %v1993_v52 }
  0xab   :  { %v823_v20 = vsel %vm821_vm12, %v822_v43, %v818_v38  ;;  %v907_v53 = vshrl.u32 %v1312_v36, %v1993_v52  ;;  %v2016_v16 = vmul.f32 %v230_v12, %v228_v1  ;;  %v374_v29 = vsub.s32 32, %v1954_v19 }
  0xac   :  { %v375_v46 = vshll.u32 %v1843_v21, %v1954_v19  ;;  %v824_v60 = vadd.s32 %v823_v20, %v819_v56  ;;  %v379_v7 = vadd.s32 127, %v378_v48  ;;  %v678_v45 = vclz %v677_v6 }
  0xad   :  { %v908_v42 = vor.u32 %v907_v53, %v906_v25  ;;  %v910_v50 = vshrl.u32 %v1313_v41, %v1993_v52  ;;  %v1144_v31 = vadd.s32 4294967294, %v524_v24  ;;  %v888_v34 = vor.u32 8388608, %v887_v57 }
  0xae   :  { %v825_v5 = vadd.s32 536870912, %v824_v60  ;;  %v2023_v35 = vor.u32 %v898_v51, %v897_v22  ;;  %v2025_v36 = vor.u32 %v901_v49, %v900_v8  ;;  %v2027_v18 = vor.u32 %v904_v39, %v903_v58 }
  0xaf   :  { %v911_v63 = vor.u32 %v910_v50, %v909_v15  ;;  %vm915_vm13 = vcmp.lt.s32.totalorder %v2001_v10, 4  ;;  %v376_v21 = vshrl.u32 %v358_v59, %v374_v29  ;;  %vm912_vm14 = vcmp.lt.s32.totalorder %v2001_v10, 1 }
  0xb0   :  { %v2030_v19 = vshrl.u32 %v825_v5, 30  ;;  %vm914_vm15 = vcmp.lt.s32.totalorder %v2001_v10, 3  ;;  %v380_v41 = vshll.u32 %v379_v7, 23  ;;  %v1147_v32 = vadd.s32 4294967294, %v678_v45 }
  0xb1   :  { %v921_v4 = vsel %vm915_vm13, %v908_v42, 920167782  ;;  %vm1145_vm1 = vcmp.lt.s32.totalorder %v1144_v31, 0  ;;  %v2037_v12 = vshll.u32 %v888_v34, 8  ;;  %vm913_vm3 = vcmp.lt.s32.totalorder %v2001_v10, 2 }
  0xb2   :  { %v827_v1 = vshll.u32 %v2030_v19, 30  ;;  %v920_v59 = vsel %vm912_vm14, %v2023_v35, %v2025_v36  ;;  %v922_v48 = vsel %vm914_vm15, %v2027_v18, %v921_v4  ;;  %v925_v24 = vsel %vm915_vm13, %v911_v63, 1326507024 }
  0xb3   :  { %v232_v38 = vxor.u32 2147483648, %v2016_v16  ;;  %v2050_v6 = vor.u32 %v376_v21, %v375_v46  ;;  %v924_v57 = vsel %vm912_vm14, %v2025_v36, %v2027_v18  ;;  %v2058_v43 = vor.u32 4788187, %v380_v41 }
  0xb4   :  { %v2052_v56 = vsub.s32 %v824_v60, %v827_v1  ;;  %v2060_v22 = vsel %vm1145_vm1, 0, %v1144_v31  ;;  %vm1148_vm6 = vcmp.lt.s32.totalorder %v1147_v32, 0  ;;  %v926_v25 = vsel %vm914_vm15, %v908_v42, %v925_v24 }
  0xb5   :  { %v923_v8 = vsel %vm913_vm3, %v920_v59, %v922_v48  ;;  %v930_v58 = vshrl.u32 %v2037_v12, 16  ;;  %v512_v15 = vadd.s32 %v1816_v55, %v1811_v3  ;;  %v528_v20 = vsub.s32 32, %v2060_v22 }
  0xb6   :  { %vm829_vm7 = vcmp.lt.s32.totalorder %v2052_v56, 0  ;;  %v830_v51 = vsub.s32 0, %v2052_v56  ;;  %v927_v49 = vsel %vm913_vm3, %v924_v57, %v926_v25  ;;  %v929_v39 = vand.u32 65535, %v2037_v12 }
  0xb7   :  { %v532_v53 = vsub.s32 4294967266, %v2060_v22  ;;  %v2076_v29 = vsel %vm1148_vm6, 0, %v1147_v32  ;;  %v931_v60 = vand.u32 65535, %v927_v49  ;;  %v384_v7 = vcvt.s32.f32 %v2050_v6 }
  0xb8   :  { %v831_v46 = vsel %vm829_vm7, %v830_v51, %v2052_v56  ;;  %v932_v42 = vshrl.u32 %v927_v49, 16  ;;  %v954_v50 = vshrl.u32 %v923_v8, 16  ;;  %v382_v3 = vand.u32 2147483647, %v2058_v43 }
  0xb9   :  { %v832_v45 = vclz %v831_v46  ;;  %v529_v55 = vshll.u32 %v1945_v11, %v2060_v22  ;;  %v935_v31 = vmul.u32 %v931_v60, %v930_v58  ;;  %v953_v5 = vand.u32 65535, %v923_v8 }
  0xba   :  { %v2083_v34 = vshrl.u32 %v512_v15, %v528_v20  ;;  %v686_v63 = vsub.s32 4294967266, %v2076_v29  ;;  %v934_v41 = vmul.u32 %v932_v42, %v929_v39  ;;  %v533_v32 = vadd.s32 127, %v532_v53 }
  0xbb   :  { %v1150_v21 = vadd.s32 4294967294, %v832_v45  ;;  %v666_v4 = vadd.s32 %v1864_v27, %v1862_v2  ;;  %v682_v1 = vsub.s32 32, %v2076_v29  ;;  %v933_v59 = vmul.u32 %v931_v60, %v929_v39 }
  0xbc   :  { %v683_v48 = vshll.u32 %v1967_v30, %v2076_v29  ;;  %v936_v24 = vmul.u32 %v932_v42, %v930_v58  ;;  %v956_v57 = vmul.u32 %v954_v50, %v929_v39  ;;  %v937_v51 = vshll.u32 %v934_v41, 16 }
  0xbd   :  { %vm1151_vm9 = vcmp.lt.s32.totalorder %v1150_v21, 0  ;;  %v939_v8 = vshll.u32 %v935_v31, 16  ;;  %v957_v15 = vmul.u32 %v953_v5, %v930_v58  ;;  %v687_v20 = vadd.s32 127, %v686_v63 }
  0xbe   :  { %v835_v25 = vsel %vm1151_vm9, 0, %v1150_v21  ;;  %v820_v49 = vadd.s32 %v1983_v26, %v1981_v54  ;;  %vm112_vm2 = vcmp.lt.s32.totalorder %v1359_v17, 0  ;;  %v896_v2 = vshrl.u32 %v1314_v44, %v1993_v52 }
  0xbf   :  { %v836_v53 = vsub.s32 32, %v835_v25  ;;  %v840_v46 = vsub.s32 4294967266, %v835_v25  ;;  %vm941_vm4 = vc.u32 %v933_v59, %v937_v51  ;;  %v943_v27 = vadd.s32 %v937_v51, %v933_v59 }
  0xc0   :  { %v955_v30 = vmul.u32 %v953_v5, %v929_v39  ;;  %v942_v60 = vsel %vm941_vm4, 1, %v1317_v61  ;;  %v958_v45 = vmul.u32 %v954_v50, %v930_v58  ;;  %v959_v42 = vshll.u32 %v956_v57, 16 }
  0xc1   :  { %v841_v29 = vadd.s32 127, %v840_v46  ;;  %v938_v21 = vshrl.u32 %v934_v41, 16  ;;  %v944_v63 = vadd.s32 %v942_v60, %v936_v24  ;;  %vm945_vm5 = vc.u32 %v943_v27, %v939_v8 }
  0xc2   :  { %v961_v37 = vshll.u32 %v957_v15, 16  ;;  %v837_v54 = vshll.u32 %v2052_v56, %v835_v25  ;;  %v838_v26 = vshrl.u32 %v820_v49, %v836_v53  ;;  %v917_v13 = vsel %vm915_vm13, %v2027_v18, 2102212464 }
  0xc3   :  { %v946_v44 = vsel %vm945_vm5, 1, %v1317_v61  ;;  %v842_v52 = vshll.u32 %v841_v29, 23  ;;  %vm963_vm10 = vc.u32 %v955_v30, %v959_v42  ;;  %v965_v5 = vadd.s32 %v959_v42, %v955_v30 }
  0xc4   :  { %v948_v39 = vadd.s32 %v946_v44, %v944_v63  ;;  %v684_v59 = vshrl.u32 %v666_v4, %v682_v1  ;;  %v688_v58 = vshll.u32 %v687_v20, 23  ;;  %v940_v50 = vshrl.u32 %v935_v31, 16 }
  0xc5   :  { %v964_v41 = vsel %vm963_vm10, 1, %v1317_v61  ;;  %v960_v51 = vshrl.u32 %v956_v57, 16  ;;  %vm967_vm8 = vc.u32 %v965_v5, %v961_v37  ;;  %v534_v56 = vshll.u32 %v533_v32, 23 }
  0xc6   :  { %v949_v24 = vadd.s32 %v948_v39, %v938_v21  ;;  %v966_v8 = vadd.s32 %v964_v41, %v958_v45  ;;  %v916_v18 = vsel %vm912_vm14, %v896_v2, %v2023_v35  ;;  %v918_v25 = vsel %vm914_vm15, %v2025_v36, %v917_v13 }
  0xc7   :  { %v968_v49 = vsel %vm967_vm8, 1, %v1317_v61  ;;  %v839_v4 = vor.u32 %v838_v26, %v837_v54  ;;  %v843_v1 = vor.u32 4788187, %v842_v52  ;;  %v962_v31 = vshrl.u32 %v957_v15, 16 }
  0xc8   :  { %v970_v20 = vadd.s32 %v968_v49, %v966_v8  ;;  %v2110_v53 = vadd.s32 %v949_v24, %v940_v50  ;;  %v2112_v57 = vadd.s32 %v965_v5, %v961_v37  ;;  %v685_v46 = vor.u32 %v684_v59, %v683_v48 }
  0xc9   :  { %v689_v32 = vor.u32 4788187, %v688_v58  ;;  %v919_v27 = vsel %vm913_vm3, %v916_v18, %v918_v25  ;;  %v2397_v2 = vand.u32 2147483647, %v1359_v17  ;;  %v233_v61 = vsel %vm112_vm2, %v232_v38, %v2016_v16 }
  0xca   :  { %v971_v35 = vadd.s32 %v970_v20, %v960_v51  ;;  %v531_v37 = vor.u32 %v2083_v34, %v529_v55  ;;  %v535_v10 = vor.u32 4788187, %v534_v56  ;;  %v385_v36 = vmul.f32 %v384_v7, %v382_v3 }
  0xcb   :  { %vm2118_vm11 = vcmp.le.f32.partialorder %v2397_v2, 0.7853982  ;;  %v844_v48 = vand.u32 2147483647, %v843_v1  ;;  %v846_v15 = vcvt.s32.f32 %v839_v4  ;;  %v973_v29 = vmul.u32 %v2037_v12, %v919_v27 }
  0xcc   :  { %v972_v30 = vadd.s32 %v971_v35, %v962_v31  ;;  %vm975_vm12 = vc.u32 %v2110_v53, %v2112_v57  ;;  %v2141_v11 = vsel %vm2118_vm11, %v1359_v17, %v233_v61  ;;  %v690_v16 = vand.u32 2147483647, %v689_v32 }
  0xcd   :  { %v692_v38 = vcvt.s32.f32 %v685_v46  ;;  %v536_v43 = vand.u32 2147483647, %v535_v10  ;;  %v538_v55 = vcvt.s32.f32 %v531_v37  ;;  %v386_v6 = vxor.u32 2147483648, %v385_v36 }
  0xce   :  { %v976_v22 = vadd.s32 1, %v972_v30  ;;  %v847_v7 = vmul.f32 %v846_v15, %v844_v48  ;;  %v2145_v34 = vmul.f32 %v2141_v11, %v2141_v11  ;;  %vm266_vm13 = vcmp.lt.s32.totalorder %v1366_v33, 0 }
  0xcf   :  { %v693_v60 = vmul.f32 %v692_v38, %v690_v16  ;;  %v539_v45 = vmul.f32 %v538_v55, %v536_v43  ;;  %v2400_v21 = vand.u32 2147483647, %v1366_v33  ;;  %v387_v54 = vsel %vm266_vm13, %v386_v6, %v385_v36 }
  0xd0   :  { %v977_v3 = vsel %vm975_vm12, %v976_v22, %v972_v30  ;;  %v848_v26 = vxor.u32 2147483648, %v847_v7  ;;  %v246_v44 = vmul.f32 -0.00019511016, %v2145_v34  ;;  %vm728_vm15 = vcmp.lt.s32.totalorder %v1683_v47, 0 }
  0xd1   :  { %v978_v12 = vadd.s32 %v977_v3, %v973_v29  ;;  %vm2150_vm14 = vcmp.le.f32.partialorder %v2400_v21, 0.7853982  ;;  %v694_v39 = vxor.u32 2147483648, %v693_v60  ;;  %v540_v59 = vxor.u32 2147483648, %v539_v45 }
  0xd2   :  { %v2163_v5 = vsel %vm2150_vm14, %v1366_v33, %v387_v54  ;;  %vm574_vm1 = vcmp.lt.s32.totalorder %v1595_v28, 0  ;;  %vm420_vm3 = vcmp.lt.s32.totalorder %v1427_v23, 0  ;;  %v2403_v50 = vand.u32 2147483647, %v1683_v47 }
  0xd3   :  { %v979_v42 = vadd.s32 536870912, %v978_v12  ;;  %v849_v24 = vsel %vm728_vm15, %v848_v26, %v847_v7  ;;  %v239_v51 = vmul.f32 -0.001358992, %v2145_v34  ;;  %v247_v8 = vadd.f32 0.008332121, %v246_v44 }
  0xd4   :  { %vm2170_vm6 = vcmp.le.f32.partialorder %v2403_v50, 0.7853982  ;;  %v2179_v18 = vmul.f32 %v2163_v5, %v2163_v5  ;;  %v2406_v25 = vand.u32 2147483647, %v1427_v23  ;;  %v2409_v4 = vand.u32 2147483647, %v1595_v28 }
  0xd5   :  { %v2158_v52 = vshrl.u32 %v979_v42, 30  ;;  %v695_v31 = vsel %vm574_vm1, %v694_v39, %v693_v60  ;;  %v541_v20 = vsel %vm420_vm3, %v540_v59, %v539_v45  ;;  %v2200_v46 = vsel %vm2170_vm6, %v1683_v47, %v849_v24 }
  0xd6   :  { %vm2183_vm7 = vcmp.le.f32.partialorder %v2406_v25, 0.7853982  ;;  %vm2189_vm9 = vcmp.le.f32.partialorder %v2409_v4, 0.7853982  ;;  %v240_v27 = vadd.f32 0.041655596, %v239_v51  ;;  %v248_v35 = vmul.f32 %v247_v8, %v2145_v34 }
  0xd7   :  { %v981_v58 = vshll.u32 %v2158_v52, 30  ;;  %v2206_v2 = vsel %vm2189_vm9, %v1595_v28, %v695_v31  ;;  %v2211_v37 = vsel %vm2183_vm7, %v1427_v23, %v541_v20  ;;  %v2215_v10 = vmul.f32 %v2200_v46, %v2200_v46 }
  0xd8   :  { %v234_v48 = vsub.s32 4, %v1604_v9  ;;  %v388_v15 = vsub.s32 4, %v1818_v62  ;;  %v400_v30 = vmul.f32 -0.00019511016, %v2179_v18  ;;  %v2222_v29 = vmul.f32 %v2206_v2, %v2206_v2 }
  0xd9   :  { %v982_v56 = vsub.s32 %v978_v12, %v981_v58  ;;  %v241_v38 = vmul.f32 %v240_v27, %v2145_v34  ;;  %v249_v22 = vadd.f32 -0.16666654, %v248_v35  ;;  %v2227_v43 = vmul.f32 %v2211_v37, %v2211_v37 }
  0xda   :  { %v393_v55 = vmul.f32 -0.001358992, %v2179_v18  ;;  %v862_v6 = vmul.f32 -0.00019511016, %v2215_v10  ;;  %v974_v7 = vadd.s32 %v2112_v57, %v2110_v53  ;;  %v235_v3 = vsel %vm112_vm2, %v234_v48, %v1604_v9 }
  0xdb   :  { %vm983_vm4 = vcmp.lt.s32.totalorder %v982_v56, 0  ;;  %v984_v32 = vsub.s32 0, %v982_v56  ;;  %v389_v12 = vsel %vm266_vm13, %v388_v15, %v1818_v62  ;;  %v401_v60 = vadd.f32 0.008332121, %v400_v30 }
  0xdc   :  { %v708_v42 = vmul.f32 -0.00019511016, %v2222_v29  ;;  %v242_v44 = vadd.f32 -0.4999988, %v241_v38  ;;  %v250_v39 = vmul.f32 %v249_v22, %v2145_v34  ;;  %v554_v53 = vmul.f32 -0.00019511016, %v2227_v43 }
  0xdd   :  { %v985_v61 = vsel %vm983_vm4, %v984_v32, %v982_v56  ;;  %v855_v57 = vmul.f32 -0.001358992, %v2215_v10  ;;  %v394_v59 = vadd.f32 0.041655596, %v393_v55  ;;  %v863_v9 = vadd.f32 0.008332121, %v862_v6 }
  0xde   :  { %v986_v36 = vclz %v985_v61  ;;  %v237_v62 = vsel %vm2118_vm11, 0, %v235_v3  ;;  %v402_v24 = vmul.f32 %v401_v60, %v2179_v18  ;;  %v547_v51 = vmul.f32 -0.001358992, %v2227_v43 }
  0xdf   :  { %v701_v8 = vmul.f32 -0.001358992, %v2222_v29  ;;  %v709_v25 = vadd.f32 0.008332121, %v708_v42  ;;  %v243_v20 = vmul.f32 %v242_v44, %v2145_v34  ;;  %v251_v32 = vadd.f32 1.0, %v250_v39 }
  0xe0   :  { %v1153_v16 = vadd.s32 4294967294, %v986_v36  ;;  %v555_v27 = vadd.f32 0.008332121, %v554_v53  ;;  %v856_v35 = vadd.f32 0.041655596, %v855_v57  ;;  %v395_v13 = vmul.f32 %v394_v59, %v2179_v18 }
  0xe1   :  { %v864_v61 = vmul.f32 %v863_v9, %v2215_v10  ;;  %v403_v15 = vadd.f32 -0.16666654, %v402_v24  ;;  %v548_v30 = vadd.f32 0.041655596, %v547_v51  ;;  %v2253_v38 = vand.u32 3, %v237_v62 }
  0xe2   :  { %vm1154_vm5 = vcmp.lt.s32.totalorder %v1153_v16, 0  ;;  %v542_v63 = vsub.s32 4, %v1904_v14  ;;  %v710_v22 = vmul.f32 %v709_v25, %v2222_v29  ;;  %v2257_v34 = vadd.f32 1.0, %v243_v20 }
  0xe3   :  { %v989_v45 = vsel %vm1154_vm5, 0, %v1153_v16  ;;  %v702_v16 = vadd.f32 0.041655596, %v701_v8  ;;  %v857_v3 = vmul.f32 %v856_v35, %v2215_v10  ;;  %v396_v60 = vadd.f32 -0.4999988, %v395_v13 }
  0xe4   :  { %v990_v21 = vsub.s32 32, %v989_v45  ;;  %v991_v54 = vshll.u32 %v982_v56, %v989_v45  ;;  %v994_v26 = vsub.s32 4294967266, %v989_v45  ;;  %v391_v56 = vsel %vm2150_vm14, 0, %v389_v12 }
  0xe5   :  { %v2259_v6 = vand.u32 3, %v391_v56  ;;  %v2264_v12 = vmul.f32 %v251_v32, %v2141_v11  ;;  %v865_v45 = vadd.f32 -0.16666654, %v864_v61  ;;  %vm882_vm2 = vcmp.lt.s32.totalorder %v1935_v0, 0 }
  0xe6   :  { %v992_v58 = vshrl.u32 %v974_v7, %v990_v21  ;;  %v995_v50 = vadd.s32 127, %v994_v26  ;;  %v556_v7 = vmul.f32 %v555_v27, %v2227_v43  ;;  %v404_v21 = vmul.f32 %v403_v15, %v2179_v18 }
  0xe7   :  { %v703_v26 = vmul.f32 %v702_v16, %v2222_v29  ;;  %v543_v44 = vsel %vm420_vm3, %v542_v63, %v1904_v14  ;;  %v711_v39 = vadd.f32 -0.16666654, %v710_v22  ;;  %v2412_v53 = vand.u32 2147483647, %v1935_v0 }
  0xe8   :  { %v993_v4 = vor.u32 %v992_v58, %v991_v54  ;;  %v996_v31 = vshll.u32 %v995_v50, 23  ;;  %v549_v54 = vmul.f32 %v548_v30, %v2227_v43  ;;  %v557_v59 = vadd.f32 -0.16666654, %v556_v7 }
  0xe9   :  { %vm2275_vm10 = vcmp.le.f32.partialorder %v2412_v53, 0.7853982  ;;  %v696_v9 = vsub.s32 4, %v1948_v40  ;;  %v850_v58 = vsub.s32 4, %v2030_v19  ;;  %v858_v50 = vadd.f32 -0.4999988, %v857_v3 }
  0xea   :  { %v997_v36 = vor.u32 4788187, %v996_v31  ;;  %v1000_v48 = vcvt.s32.f32 %v993_v4  ;;  %v397_v62 = vmul.f32 %v396_v60, %v2179_v18  ;;  %v866_v24 = vmul.f32 %v865_v45, %v2215_v10 }
  0xeb   :  { %v1004_v51 = vsub.s32 4, %v2158_v52  ;;  %v405_v8 = vadd.f32 1.0, %v404_v21  ;;  %v550_v56 = vadd.f32 -0.4999988, %v549_v54  ;;  %v704_v25 = vadd.f32 -0.4999988, %v703_v26 }
  0xec   :  { %v998_v55 = vand.u32 2147483647, %v997_v36  ;;  %v260_v31 = vxor.u32 2147483648, %v2257_v34  ;;  %v545_v18 = vsel %vm2183_vm7, 0, %v543_v44  ;;  %v712_v20 = vmul.f32 %v711_v39, %v2222_v29 }
  0xed   :  { %v558_v27 = vmul.f32 %v557_v59, %v2227_v43  ;;  %v697_v35 = vsel %vm574_vm1, %v696_v9, %v1948_v40  ;;  %v851_v13 = vsel %vm728_vm15, %v850_v58, %v2030_v19  ;;  %v859_v61 = vmul.f32 %v858_v50, %v2215_v10 }
  0xee   :  { %v1001_v42 = vmul.f32 %v1000_v48, %v998_v55  ;;  %v867_v36 = vadd.f32 1.0, %v866_v24  ;;  %v1005_v49 = vsel %vm882_vm2, %v1004_v51, %v2158_v52  ;;  %v2308_v30 = vadd.f32 1.0, %v397_v62 }
  0xef   :  { %v2311_v16 = vmul.f32 %v405_v8, %v2163_v5  ;;  %v551_v40 = vmul.f32 %v550_v56, %v2227_v43  ;;  %v705_v63 = vmul.f32 %v704_v25, %v2222_v29  ;;  %v713_v22 = vadd.f32 1.0, %v712_v20 }
  0xf0   :  { %v1002_v57 = vxor.u32 2147483648, %v1001_v42  ;;  %v853_v19 = vsel %vm2170_vm6, 0, %v851_v13  ;;  %v559_v7 = vadd.f32 1.0, %v558_v27  ;;  %v2317_v3 = vand.u32 3, %v545_v18 }
  0xf1   :  { %v699_v52 = vsel %vm2189_vm9, 0, %v697_v35  ;;  %v1007_v5 = vsel %vm2275_vm10, 0, %v1005_v49  ;;  %v860_v60 = vadd.f32 1.0, %v859_v61  ;;  %v868_v43 = vmul.f32 %v867_v36, %v2200_v46 }
  0xf2   :  { %v1003_v14 = vsel %vm882_vm2, %v1002_v57, %v1001_v42  ;;  %v414_v42 = vxor.u32 2147483648, %v2308_v30  ;;  %v552_v41 = vadd.f32 1.0, %v551_v40  ;;  %v706_v21 = vadd.f32 1.0, %v705_v63 }
  0xf3   :  { %v2289_v4 = vsel %vm2275_vm10, %v1935_v0, %v1003_v14  ;;  %v870_v54 = vand.u32 3, %v853_v19  ;;  %v714_v26 = vmul.f32 %v713_v22, %v2206_v2  ;;  %v716_v44 = vand.u32 3, %v699_v52 }
  0xf4   :  { %v1008_v32 = vmul.f32 %v2289_v4, %v2289_v4  ;;  %vm410_vm8 = vcmp.eq.s32.totalorder %v2259_v6, 0  ;;  %v411_v1 = vxor.u32 2147483648, %v2311_v16  ;;  %vm413_vm11 = vcmp.eq.s32.totalorder %v2259_v6, 2 }
  0xf5   :  { %v560_v46 = vmul.f32 %v559_v7, %v2211_v37  ;;  %vm564_vm12 = vcmp.eq.s32.totalorder %v2317_v3, 0  ;;  %v1024_v11 = vand.u32 3, %v1007_v5  ;;  %v873_v57 = vxor.u32 2147483648, %v868_v43  ;;  %v35_v7 = vld [vmem:[#allocation3] sm:$0xff] }
  0xf6   :  { %v1009_v48 = vmul.f32 -0.001358992, %v1008_v32  ;;  %v1016_v15 = vmul.f32 -0.00019511016, %v1008_v32  ;;  %v876_v59 = vxor.u32 2147483648, %v860_v60  ;;  %vm256_vm13 = vcmp.eq.s32.totalorder %v2253_v38, 0 }
  0xf7   :  { %vm259_vm14 = vcmp.eq.s32.totalorder %v2253_v38, 2  ;;  %v568_v2 = vxor.u32 2147483648, %v552_v41  ;;  %v722_v50 = vxor.u32 2147483648, %v706_v21  ;;  %vm872_vm15 = vcmp.eq.s32.totalorder %v870_v54, 0 }
  0xf8   :  { %v1010_v10 = vadd.f32 0.041655596, %v1009_v48  ;;  %v1017_v55 = vadd.f32 0.008332121, %v1016_v15  ;;  %vm875_vm1 = vcmp.eq.s32.totalorder %v870_v54, 2  ;;  %v719_v62 = vxor.u32 2147483648, %v714_v26 }
  0xf9   :  { %vm721_vm3 = vcmp.eq.s32.totalorder %v716_v44, 2  ;;  %v565_v37 = vxor.u32 2147483648, %v560_v46  ;;  %vm718_vm6 = vcmp.eq.s32.totalorder %v716_v44, 0  ;;  %vm871_vm7 = vcmp.lt.s32.totalorder %v870_v54, 2 }
  0xfa   :  { %v1011_v45 = vmul.f32 %v1010_v10, %v1008_v32  ;;  %v1018_v29 = vmul.f32 %v1017_v55, %v1008_v32  ;;  %vm1029_vm9 = vcmp.eq.s32.totalorder %v1024_v11, 2  ;;  %v874_v51 = vsel %vm872_vm15, %v860_v60, %v873_v57 }
  0xfb   :  { %v877_v8 = vsel %vm875_vm1, %v876_v59, %v868_v43  ;;  %vm567_vm4 = vcmp.eq.s32.totalorder %v2317_v3, 2  ;;  %vm717_vm5 = vcmp.lt.s32.totalorder %v716_v44, 2  ;;  %v723_v18 = vsel %vm721_vm3, %v722_v50, %v714_v26 }
  0xfc   :  { %v1012_v39 = vadd.f32 -0.4999988, %v1011_v45  ;;  %v1019_v53 = vadd.f32 -0.16666654, %v1018_v29  ;;  %vm1026_vm2 = vcmp.eq.s32.totalorder %v1024_v11, 0  ;;  %v720_v20 = vsel %vm718_vm6, %v706_v21, %v719_v62 }
  0xfd   :  { %vm1025_vm10 = vcmp.lt.s32.totalorder %v1024_v11, 2  ;;  %v257_v35 = vxor.u32 2147483648, %v2264_v12  ;;  %vm869_vm0 = vweird.f32 %v1683_v47  ;;  %v878_v13 = vsel %vm871_vm7, %v874_v51, %v877_v8 }
  0xfe   :  { %v1013_v9 = vmul.f32 %v1012_v39, %v1008_v32  ;;  %v1020_v58 = vmul.f32 %v1019_v53, %v1008_v32  ;;  %vm1023_vm15 = vweird.f32 %v1935_v0  ;;  %vm563_vm1 = vcmp.lt.s32.totalorder %v2317_v3, 2 }
  0xff   :  { %v569_v61 = vsel %vm567_vm4, %v568_v2, %v560_v46  ;;  %vm409_vm3 = vcmp.lt.s32.totalorder %v2259_v6, 2  ;;  %vm715_vm6 = vweird.f32 %v1595_v28  ;;  %v724_v49 = vsel %vm717_vm5, %v720_v20, %v723_v18 }
 0x100   :  { %v1014_v24 = vadd.f32 1.0, %v1013_v9  ;;  %v1021_v14 = vadd.f32 1.0, %v1020_v58  ;;  %v412_v47 = vsel %vm410_vm8, %v2308_v30, %v411_v1  ;;  %v415_v0 = vsel %vm413_vm11, %v414_v42, %v2311_v16 }
 0x101   :  { %v879_v15 = vsel %vm869_vm0, nan, %v878_v13  ;;  %vm255_vm7 = vcmp.lt.s32.totalorder %v2253_v38, 2  ;;  %v258_v28 = vsel %vm256_vm13, %v2257_v34, %v257_v35  ;;  %v261_v30 = vsel %vm259_vm14, %v260_v31, %v2264_v12  ;;  %v1034_v38 = vld [vmem:[#allocation2] sm:$0xff] }
 0x102   :  { %v1022_v56 = vmul.f32 %v1021_v14, %v2289_v4  ;;  %v1030_v25 = vxor.u32 2147483648, %v1014_v24  ;;  %v566_v4 = vsel %vm564_vm12, %v552_v41, %v565_v37  ;;  %vm561_vm12 = vweird.f32 %v1427_v23 }
 0x103   :  { %v570_v63 = vsel %vm563_vm1, %v566_v4, %v569_v61  ;;  %v725_v22 = vsel %vm715_vm6, nan, %v724_v49  ;;  %vm407_vm0 = vweird.f32 %v1366_v33  ;;  %v416_v23 = vsel %vm409_vm3, %v412_v47, %v415_v0 }
 0x104   :  { %v1027_v32 = vxor.u32 2147483648, %v1022_v56  ;;  %v1031_v27 = vsel %vm1029_vm9, %v1030_v25, %v1022_v56  ;;  %v571_v16 = vsel %vm561_vm12, nan, %v570_v63  ;;  %vm253_vm8 = vweird.f32 %v1359_v17 }
 0x105   :  { %v262_v19 = vsel %vm255_vm7, %v258_v28, %v261_v30  ;;  %v417_v10 = vsel %vm407_vm0, nan, %v416_v23  ;;  %vm2415_vm11 = vcmask 392192   ;;  %vm1067_vm14 = vcmask 388098  }
 0x106   :  { %v1028_v36 = vsel %vm1026_vm2, %v1014_v24, %v1027_v32  ;;  %v263_v55 = vsel %vm253_vm8, nan, %v262_v19  ;;  %vm2416_vm13 = vmmov %vm2415_vm11  ;;  %vm1065_vm9 = vcmask 386048   ;;  %vm1069_vm4 = vcmask 390148  }
 0x107   :  { %v1032_v48 = vsel %vm1025_vm10, %v1028_v36, %v1031_v27  ;;  %vm1071_vm5 = vcmask 392198  }
 0x108   :  { %v1033_v40 = vsel %vm1023_vm15, nan, %v1032_v48 }
 0x109   :  { %1049 = vmatpush.msra.mxu0 %v1033_v40 }
 0x10b   :  { %1050 = vmatpush.msra.mxu0 %v879_v15 }
 0x10d   :  { %1051 = vmatpush.msra.mxu0 %v725_v22 }
 0x10f   :  { %1052 = vmatpush.msra.mxu0 %v571_v16 }
 0x111   :  { %1053 = vmatpush.msra.mxu0 %v417_v10 }
 0x113   :  { %1054 = vmatpush.msra.mxu0 %v263_v55 }
 0x114   :  { %1155 = vmatmul.msk.f32.vlgmr.msra.gmra.mxu0 %vm2415_vm11, %v35_v7 }
 0x191   :  { %v1056_v34 = vpop.f32.mrf.mxu0 }
 0x192   :  { %v1059_v33 = vadd.f32 %v1056_v34, %v1034_v38 }
 0x194   :  { %1060 = vst.msk [vmem:[#allocation2] sm:$0xff] %vm2416_vm13, %v1059_v33 }
 0x19b   :  { %v1064_v17 = vld [vmem:[#allocation2] sm:$0xff] }
 0x19c   :  { %1068 = vst.msk [vmem:[#allocation7 - $0x2] sm:$0xc] %vm1067_vm14, %v1064_v17 }
 0x19d   :  { %1094 = dma.vmem_to_hbm [thread:$0]  %s1090_s20, 32, %s1092_s23, [#allocation8]   ;;  %1066 = vst.msk [vmem:[#allocation6] sm:$0x3] %vm1065_vm9, %v1064_v17 }
 0x19e   :  { %1070 = vst.msk [vmem:[#allocation9 - $0x4] sm:$0x30] %vm1069_vm4, %v1064_v17  ;;  %1083 = dma.vmem_to_hbm [thread:$0]  %s1079_s25, 32, %s1081_s28, [#allocation5]  }
 0x19f   :  { %1072 = vst.msk [vmem:[#allocation10 - $0x6] sm:$0xc0] %vm1071_vm5, %v1064_v17  ;;  %1105 = dma.vmem_to_hbm [thread:$0]  %s1101_s30, 32, %s1103_s7, [#allocation8]  }
 0x1a0   :  { %1116 = dma.vmem_to_hbm [thread:$0]  %s1112_s9, 32, %s1114_s11, [#allocation11]  }
 0x1a1   :  { %1303 = dma.done.wait [#allocation5], 32  }
 0x1a2   :  { %1304 = vsyncadd [#allocation5], 4294967264 }
 0x1a3   :  { %1305 = dma.done.wait [#allocation8], 64  }
 0x1a4   :  { %1306 = vsyncadd [#allocation8], 4294967232 }
 0x1a5   :  { %1307 = dma.done.wait [#allocation11], 32  }
 0x1a6   :  { %1308 = vsyncadd [#allocation11], 4294967264 }
 0x1a7   :  { %1133 = vsyncpa [#allocation4], 1 }
 0x1a8   :  { %1134 = vsyncpa [#allocation5], 1 }
 0x1a9   :  { %1135 = vsyncpa [#allocation8], 1 }
 0x1aa   :  { %1136 = vsyncpa [#allocation11], 1 }

</bundles_post_ra>
